<compile_context>
chip_gen: v7x
topology: tpu7x:2x2x1
jax: 0.10.0
libtpu: 0.0.40
codegen_flags: <defaults>
</compile_context>

<pallas_src>
from functools import partial

import jax
import jax.numpy as jnp
from jax import lax
from jax.experimental import pallas as pl
from jax.experimental.pallas import tpu as pltpu

DIL = 2          # dilation
K = 3            # kernel size (asserted == 3 in the PyTorch module)
EPS = 1e-5       # nn.BatchNorm2d default eps


def _pick_row_tile(N, H, W, Cin, Cp, Cout, in_itemsize, budget_bytes=24 << 20):
    """Largest divisor of H whose *full* per-step working set fits the budget.

    Accounts for: double-buffered full padded input block, double-buffered
    folded weights, the f32 accumulator + im2col temporaries, the halo window
    load, and the double-buffered pass-2 output tile.  Also requires Th*W to be
    a multiple of 128 (or Th == H) so the pass-2 NCHW output block stays
    lane-dense, and prefers >= 2 parallel grid points (v7x megacore)."""
    Hp, Wp_ = H + 2 * DIL, W + 2 * DIL
    fixed = (2 * Hp * Wp_ * Cin * in_itemsize        # double-buffered input block
             + 2 * K * K * Cin * Cp * in_itemsize    # double-buffered folded weights
             + 8 * Cp * 4)                           # scale/shift/psum/psq blocks (tiny)
    valid = []
    for th in range(1, H + 1):
        if H % th:
            continue
        if (th * W) % 128 != 0 and th != H:
            continue                                 # keep pass-2 output block lane-dense
        per_tile = (3 * th * W * Cp * 4                         # f32 acc + temporaries
                    + (th + 2 * DIL) * Wp_ * Cin * in_itemsize  # halo window load
                    + 2 * th * W * Cin * in_itemsize            # tap temporaries
                    + 2 * th * W * Cout * 4)                    # double-buffered out tile
        if fixed + per_tile <= budget_bytes:
            valid.append(th)
    if not valid:
        valid = [t for t in range(1, H + 1)
                 if H % t == 0 and ((t * W) % 128 == 0 or t == H)]
        return min(valid)
    best = max(valid)
    if N * (H // best) < 2:                          # v7x: feed both TensorCores
        cand = [t for t in valid if H // t >= 2]
        if cand:
            best = max(cand)
    return best


def _conv_tile(xp_ref, wf_ref, th, w, cin, cp):
    """Conv output (bias-free) for the current (image, row-tile) grid point.

    xp_ref : (1, H+2*DIL, W+2*DIL, Cin) padded image, compute dtype (bf16)
    wf_ref : (9*Cin, Cp) folded depthwise*pointwise weight, compute dtype
    returns: (th*w, Cp) float32
    """
    row0 = pl.program_id(1) * th
    if (th & (th - 1)) == 0:                         # power-of-two tile -> alignment hint
        row0 = pl.multiple_of(row0, th)

    # One dynamic-sliced load of the rows this tile needs (incl. 2*DIL halo),
    # kept in the storage/compute dtype (no eager f32 upcast).
    xw = xp_ref[:, pl.ds(row0, th + 2 * DIL), :, :][0]   # (th+2*DIL, Wp, Cin)

    # 9 dilation-shifted taps -> 9 accumulating bf16 MXU dots (f32 accumulator).
    acc = None
    for kh in range(K):
        for kw in range(K):
            tap = xw[kh * DIL:kh * DIL + th, kw * DIL:kw * DIL + w, :]
            tap = tap.reshape(th * w, cin)
            wk = wf_ref[(kh * K + kw) * cin:(kh * K + kw + 1) * cin, :]
            d = jnp.dot(tap, wk, preferred_element_type=jnp.float32)
            acc = d if acc is None else acc + d
    return acc                                            # (th*w, cp) f32


def _stats_kernel(xp_ref, wf_ref, psum_ref, psq_ref, *, th, w, cin, cp):
    """Pass 1: per-tile per-channel sum / sum-of-squares of the bias-free conv."""
    y0 = _conv_tile(xp_ref, wf_ref, th, w, cin, cp)
    psum_ref[...] = jnp.sum(y0, axis=0).reshape(1, 1, 1, cp)
    psq_ref[...] = jnp.sum(y0 * y0, axis=0).reshape(1, 1, 1, cp)


def _conv_bn_relu_kernel(xp_ref, wf_ref, scale_ref, shift_ref, o_ref,
                         *, th, w, cin, cp, cout):
    """Pass 2: recompute the conv tile, apply BN scale/shift + ReLU, and store
    directly in NCHW layout (lane dim = th*w, a multiple of 128)."""
    y0 = _conv_tile(xp_ref, wf_ref, th, w, cin, cp)
    z = jnp.maximum(y0 * scale_ref[...] + shift_ref[...], 0.0)    # (th*w, cp)
    zt = jnp.transpose(z[:, :cout])                               # (cout, th*w)
    o_ref[...] = zt[None].astype(o_ref.dtype)


def dil_conv(x_nchw, wd, bd, wp, bp, gamma, beta, *, compute_dtype=jnp.bfloat16):
    """strides=1 Dil_Conv forward.  NCHW in, NCHW out.

    wd: (9, Cin) depthwise taps (row = kh*3+kw), bd: (1, Cin),
    wp: (Cin, Cout), bp: (1, Cout), gamma/beta: (1, Cout).
    Note: bd/bp (the conv biases) cancel exactly under training-mode BatchNorm,
    so they do not enter the computation (kept in the signature for API parity).
    """
    del bd, bp
    N, Cin, H, W = x_nchw.shape
    Cout = wp.shape[1]
    Cp = ((Cout + 127) // 128) * 128                 # lane-dense channel padding
    f32 = jnp.float32
    in_itemsize = jnp.dtype(compute_dtype).itemsize

    # NHWC + halo pad, in the compute dtype (single wrapper-side round trip).
    x = jnp.transpose(x_nchw, (0, 2, 3, 1)).astype(compute_dtype)
    xp = jnp.pad(x, ((0, 0), (DIL, DIL), (DIL, DIL), (0, 0)))
    Hp, Wp_ = H + 2 * DIL, W + 2 * DIL

    # Fold depthwise into pointwise: Wf[k*Cin+c, o] = wd[k,c]*wp[c,o]; cast bf16.
    wf = (wd.astype(f32)[:, :, None] * wp.astype(f32)[None]).reshape(K * K * Cin, Cout)
    wf = jnp.pad(wf, ((0, 0), (0, Cp - Cout))).astype(compute_dtype)
    gp = jnp.pad(gamma.reshape(Cout).astype(f32), (0, Cp - Cout))
    bt = jnp.pad(beta.reshape(Cout).astype(f32), (0, Cp - Cout))

    Th = _pick_row_tile(N, H, W, Cin, Cp, Cout, in_itemsize)
    HT = H // Th
    grid = (N, HT)

    cparams = pltpu.CompilerParams(
        dimension_semantics=("parallel", "parallel"),
        vmem_limit_bytes=48 * 1024 * 1024)

    flops_conv = 2 * N * H * W * (K * K * Cin) * Cp
    x_bytes = N * Hp * Wp_ * Cin * in_itemsize
    wf_bytes = K * K * Cin * Cp * in_itemsize
    cost1 = pl.CostEstimate(
        flops=flops_conv + 3 * N * H * W * Cp,
        transcendentals=0,
        bytes_accessed=x_bytes + wf_bytes + 2 * N * HT * Cp * 4)
    cost2 = pl.CostEstimate(
        flops=flops_conv + 3 * N * H * W * Cp,
        transcendentals=0,
        bytes_accessed=(x_bytes + wf_bytes + 2 * Cp * 4
                        + N * Cout * H * W * x_nchw.dtype.itemsize))

    # ---- pass 1: bias-free conv (bf16 MXU) -> per-tile BN partial sums --------
    psum, psq = pl.pallas_call(
        partial(_stats_kernel, th=Th, w=W, cin=Cin, cp=Cp),
        grid=grid,
        in_specs=[
            pl.BlockSpec((1, Hp, Wp_, Cin), lambda n, h: (n, 0, 0, 0)),
            pl.BlockSpec((K * K * Cin, Cp), lambda n, h: (0, 0)),
        ],
        out_specs=[
            pl.BlockSpec((1, 1, 1, Cp), lambda n, h: (n, h, 0, 0)),
            pl.BlockSpec((1, 1, 1, Cp), lambda n, h: (n, h, 0, 0)),
        ],
        out_shape=(
            jax.ShapeDtypeStruct((N, HT, 1, Cp), f32),
            jax.ShapeDtypeStruct((N, HT, 1, Cp), f32),
        ),
        compiler_params=cparams,
        cost_estimate=cost1,
    )(xp, wf)

    # ---- global training-mode BN stats (tiny per-channel reduction, plain JAX) -
    cnt = f32(N * H * W)
    m0 = jnp.sum(psum, axis=(0, 1, 2)) / cnt                       # mean of bias-free y
    var = jnp.maximum(jnp.sum(psq, axis=(0, 1, 2)) / cnt - m0 * m0, 0.0)
    inv = lax.rsqrt(var + EPS)
    scale = (gp * inv).reshape(1, Cp)
    shift = (bt - m0 * gp * inv).reshape(1, Cp)

    # ---- pass 2: recompute conv tile, fuse BN + ReLU, store NCHW lane-dense ---
    out_flat = pl.pallas_call(
        partial(_conv_bn_relu_kernel, th=Th, w=W, cin=Cin, cp=Cp, cout=Cout),
        grid=grid,
        in_specs=[
            pl.BlockSpec((1, Hp, Wp_, Cin), lambda n, h: (n, 0, 0, 0)),
            pl.BlockSpec((K * K * Cin, Cp), lambda n, h: (0, 0)),
            pl.BlockSpec((1, Cp), lambda n, h: (0, 0)),
            pl.BlockSpec((1, Cp), lambda n, h: (0, 0)),
        ],
        out_specs=pl.BlockSpec((1, Cout, Th * W), lambda n, h: (n, 0, h)),
        out_shape=jax.ShapeDtypeStruct((N, Cout, H * W), x_nchw.dtype),
        compiler_params=cparams,
        cost_estimate=cost2,
    )(xp, wf, scale, shift)

    return out_flat.reshape(N, Cout, H, W)                        # free reshape, NCHW


def ref_dil_conv(x, wd9, bd, wp, bp, gamma, beta):
    """Pure-JAX f32 reference matching the PyTorch forward semantics (NCHW)."""
    N, Cin, H, W = x.shape
    Cout = wp.shape[1]
    wd = wd9.reshape(K, K, Cin)
    w_dw = jnp.transpose(wd, (2, 0, 1))[:, None, :, :]            # (Cin, 1, K, K)
    y = lax.conv_general_dilated(
        x, w_dw, window_strides=(1, 1), padding=((DIL, DIL), (DIL, DIL)),
        rhs_dilation=(DIL, DIL), feature_group_count=Cin,
        dimension_numbers=("NCHW", "OIHW", "NCHW"))
    y = y + bd.reshape(1, Cin, 1, 1)
    w_pw = jnp.transpose(wp, (1, 0))[:, :, None, None]            # (Cout, Cin, 1, 1)
    z = lax.conv_general_dilated(
        y, w_pw, (1, 1), "VALID", dimension_numbers=("NCHW", "OIHW", "NCHW"))
    z = z + bp.reshape(1, Cout, 1, 1)
    mean = jnp.mean(z, axis=(0, 2, 3), keepdims=True)
    var = jnp.mean((z - mean) ** 2, axis=(0, 2, 3), keepdims=True)
    zn = (z - mean) * lax.rsqrt(var + EPS)
    zn = zn * gamma.reshape(1, Cout, 1, 1) + beta.reshape(1, Cout, 1, 1)
    return jnp.maximum(zn, 0.0)


if __name__ == "__main__":
    key = jax.random.PRNGKey(0)
    N, Cin, H, W = 2, 4, 16, 16
    Cout = 8

    ks = jax.random.split(key, 5)
    x = jax.random.normal(ks[0], (N, Cin, H, W), jnp.float32)
    # deterministic synthetic parameters (shapes from the module's __init__)
    wd = jax.random.normal(ks[1], (K * K, Cin), jnp.float32) * 0.2    # depthwise (Cin,1,3,3) flattened
    bd = jax.random.normal(ks[2], (1, Cin), jnp.float32) * 0.1
    wp = jax.random.normal(ks[3], (Cin, Cout), jnp.float32) * 0.2     # pointwise (Cout,Cin,1,1)
    bp = jax.random.normal(ks[4], (1, Cout), jnp.float32) * 0.1
    gamma = jnp.ones((1, Cout), jnp.float32)                          # BN affine init
    beta = jnp.zeros((1, Cout), jnp.float32)

    out = dil_conv(x, wd, bd, wp, bp, gamma, beta)
    out = jax.block_until_ready(out)

    ref = ref_dil_conv(x, wd, bd.reshape(-1), wp, bp.reshape(-1),
                       gamma.reshape(-1), beta.reshape(-1))
    assert out.shape == (N, Cout, H, W)
    # Kernel uses bf16 MXU operands (f32 accumulation), so compare with a
    # bf16-appropriate tolerance against the f32 reference.
    max_err = float(jnp.max(jnp.abs(out - ref)))
    assert jnp.allclose(out, ref, atol=2e-2, rtol=2e-2), max_err

    print("KERNEL_OK")
</pallas_src>

<mosaic_0001>
module attributes {stable_mosaic.version = 11 : i64} {
  func.func @_stats_kernel(%arg0: i32, %arg1: i32, %arg2: memref<1x20x20x4xbf16, #tpu.memory_space<vmem>>, %arg3: memref<36x128xbf16, #tpu.memory_space<vmem>>, %arg4: memref<1x1x1x128xf32, #tpu.memory_space<vmem>>, %arg5: memref<1x1x1x128xf32, #tpu.memory_space<vmem>>) attributes {dimension_semantics = [#tpu.dimension_semantics<parallel>, #tpu.dimension_semantics<parallel>], iteration_bounds = array<i64: 2, 1>, scalar_prefetch = 0 : i64, scratch_operands = 0 : i64, tpu.core_type = #tpu.core_type<tc>, window_params = [{transform_indices = @transform_0, window_bounds = array<i64: 1, 20, 20, 4>}, {pipeline_mode = #tpu.pipeline_mode<synchronous>, transform_indices = @transform_1, window_bounds = array<i64: 36, 128>}, {transform_indices = @transform_2, window_bounds = array<i64: 1, 1, 1, 128>}, {transform_indices = @transform_3, window_bounds = array<i64: 1, 1, 1, 128>}]} {
    %c16_i32 = arith.constant 16 : i32
    %0 = arith.muli %arg1, %c16_i32 : i32
    %1 = tpu.assume_multiple %0, 16 : i32
    %c0 = arith.constant 0 : index
    %2 = arith.index_cast %1 : i32 to index
    %c0_0 = arith.constant 0 : index
    %c0_1 = arith.constant 0 : index
    %3 = vector.load %arg2[%c0, %2, %c0_0, %c0_1] : memref<1x20x20x4xbf16, #tpu.memory_space<vmem>>, vector<1x20x20x4xbf16>
    %4 = vector.shape_cast %3 : vector<1x20x20x4xbf16> to vector<20x20x4xbf16>
    %5 = vector.extract_strided_slice %4 {offsets = [0, 0, 0], sizes = [16, 16, 4], strides = [1, 1, 1]} : vector<20x20x4xbf16> to vector<16x16x4xbf16>
    %6 = vector.shape_cast %5 : vector<16x16x4xbf16> to vector<256x4xbf16>
    %c0_2 = arith.constant 0 : index
    %c0_3 = arith.constant 0 : index
    %7 = vector.load %arg3[%c0_2, %c0_3] : memref<36x128xbf16, #tpu.memory_space<vmem>>, vector<4x128xbf16>
    %cst = arith.constant dense<0.000000e+00> : vector<256x128xf32>
    %8 = tpu.matmul %6, %7, %cst {dimension_numbers = #tpu.dot_dimension_numbers<[1], [0], [0], [1], [0, 0, 1, 1], [], []>} : vector<256x4xbf16>, vector<4x128xbf16>, vector<256x128xf32> -> vector<256x128xf32>
    %9 = vector.extract_strided_slice %4 {offsets = [0, 2, 0], sizes = [16, 16, 4], strides = [1, 1, 1]} : vector<20x20x4xbf16> to vector<16x16x4xbf16>
    %10 = vector.shape_cast %9 : vector<16x16x4xbf16> to vector<256x4xbf16>
    %c4 = arith.constant 4 : index
    %c0_4 = arith.constant 0 : index
    %11 = vector.load %arg3[%c4, %c0_4] : memref<36x128xbf16, #tpu.memory_space<vmem>>, vector<4x128xbf16>
    %cst_5 = arith.constant dense<0.000000e+00> : vector<256x128xf32>
    %12 = tpu.matmul %10, %11, %cst_5 {dimension_numbers = #tpu.dot_dimension_numbers<[1], [0], [0], [1], [0, 0, 1, 1], [], []>} : vector<256x4xbf16>, vector<4x128xbf16>, vector<256x128xf32> -> vector<256x128xf32>
    %13 = arith.addf %8, %12 : vector<256x128xf32>
    %14 = vector.extract_strided_slice %4 {offsets = [0, 4, 0], sizes = [16, 16, 4], strides = [1, 1, 1]} : vector<20x20x4xbf16> to vector<16x16x4xbf16>
    %15 = vector.shape_cast %14 : vector<16x16x4xbf16> to vector<256x4xbf16>
    %c8 = arith.constant 8 : index
    %c0_6 = arith.constant 0 : index
    %16 = vector.load %arg3[%c8, %c0_6] : memref<36x128xbf16, #tpu.memory_space<vmem>>, vector<4x128xbf16>
    %cst_7 = arith.constant dense<0.000000e+00> : vector<256x128xf32>
    %17 = tpu.matmul %15, %16, %cst_7 {dimension_numbers = #tpu.dot_dimension_numbers<[1], [0], [0], [1], [0, 0, 1, 1], [], []>} : vector<256x4xbf16>, vector<4x128xbf16>, vector<256x128xf32> -> vector<256x128xf32>
    %18 = arith.addf %13, %17 : vector<256x128xf32>
    %19 = vector.extract_strided_slice %4 {offsets = [2, 0, 0], sizes = [16, 16, 4], strides = [1, 1, 1]} : vector<20x20x4xbf16> to vector<16x16x4xbf16>
    %20 = vector.shape_cast %19 : vector<16x16x4xbf16> to vector<256x4xbf16>
    %c12 = arith.constant 12 : index
    %c0_8 = arith.constant 0 : index
    %21 = vector.load %arg3[%c12, %c0_8] : memref<36x128xbf16, #tpu.memory_space<vmem>>, vector<4x128xbf16>
    %cst_9 = arith.constant dense<0.000000e+00> : vector<256x128xf32>
    %22 = tpu.matmul %20, %21, %cst_9 {dimension_numbers = #tpu.dot_dimension_numbers<[1], [0], [0], [1], [0, 0, 1, 1], [], []>} : vector<256x4xbf16>, vector<4x128xbf16>, vector<256x128xf32> -> vector<256x128xf32>
    %23 = arith.addf %18, %22 : vector<256x128xf32>
    %24 = vector.extract_strided_slice %4 {offsets = [2, 2, 0], sizes = [16, 16, 4], strides = [1, 1, 1]} : vector<20x20x4xbf16> to vector<16x16x4xbf16>
    %25 = vector.shape_cast %24 : vector<16x16x4xbf16> to vector<256x4xbf16>
    %c16 = arith.constant 16 : index
    %c0_10 = arith.constant 0 : index
    %26 = vector.load %arg3[%c16, %c0_10] : memref<36x128xbf16, #tpu.memory_space<vmem>>, vector<4x128xbf16>
    %cst_11 = arith.constant dense<0.000000e+00> : vector<256x128xf32>
    %27 = tpu.matmul %25, %26, %cst_11 {dimension_numbers = #tpu.dot_dimension_numbers<[1], [0], [0], [1], [0, 0, 1, 1], [], []>} : vector<256x4xbf16>, vector<4x128xbf16>, vector<256x128xf32> -> vector<256x128xf32>
    %28 = arith.addf %23, %27 : vector<256x128xf32>
    %29 = vector.extract_strided_slice %4 {offsets = [2, 4, 0], sizes = [16, 16, 4], strides = [1, 1, 1]} : vector<20x20x4xbf16> to vector<16x16x4xbf16>
    %30 = vector.shape_cast %29 : vector<16x16x4xbf16> to vector<256x4xbf16>
    %c20 = arith.constant 20 : index
    %c0_12 = arith.constant 0 : index
    %31 = vector.load %arg3[%c20, %c0_12] : memref<36x128xbf16, #tpu.memory_space<vmem>>, vector<4x128xbf16>
    %cst_13 = arith.constant dense<0.000000e+00> : vector<256x128xf32>
    %32 = tpu.matmul %30, %31, %cst_13 {dimension_numbers = #tpu.dot_dimension_numbers<[1], [0], [0], [1], [0, 0, 1, 1], [], []>} : vector<256x4xbf16>, vector<4x128xbf16>, vector<256x128xf32> -> vector<256x128xf32>
    %33 = arith.addf %28, %32 : vector<256x128xf32>
    %34 = vector.extract_strided_slice %4 {offsets = [4, 0, 0], sizes = [16, 16, 4], strides = [1, 1, 1]} : vector<20x20x4xbf16> to vector<16x16x4xbf16>
    %35 = vector.shape_cast %34 : vector<16x16x4xbf16> to vector<256x4xbf16>
    %c24 = arith.constant 24 : index
    %c0_14 = arith.constant 0 : index
    %36 = vector.load %arg3[%c24, %c0_14] : memref<36x128xbf16, #tpu.memory_space<vmem>>, vector<4x128xbf16>
    %cst_15 = arith.constant dense<0.000000e+00> : vector<256x128xf32>
    %37 = tpu.matmul %35, %36, %cst_15 {dimension_numbers = #tpu.dot_dimension_numbers<[1], [0], [0], [1], [0, 0, 1, 1], [], []>} : vector<256x4xbf16>, vector<4x128xbf16>, vector<256x128xf32> -> vector<256x128xf32>
    %38 = arith.addf %33, %37 : vector<256x128xf32>
    %39 = vector.extract_strided_slice %4 {offsets = [4, 2, 0], sizes = [16, 16, 4], strides = [1, 1, 1]} : vector<20x20x4xbf16> to vector<16x16x4xbf16>
    %40 = vector.shape_cast %39 : vector<16x16x4xbf16> to vector<256x4xbf16>
    %c28 = arith.constant 28 : index
    %c0_16 = arith.constant 0 : index
    %41 = vector.load %arg3[%c28, %c0_16] : memref<36x128xbf16, #tpu.memory_space<vmem>>, vector<4x128xbf16>
    %cst_17 = arith.constant dense<0.000000e+00> : vector<256x128xf32>
    %42 = tpu.matmul %40, %41, %cst_17 {dimension_numbers = #tpu.dot_dimension_numbers<[1], [0], [0], [1], [0, 0, 1, 1], [], []>} : vector<256x4xbf16>, vector<4x128xbf16>, vector<256x128xf32> -> vector<256x128xf32>
    %43 = arith.addf %38, %42 : vector<256x128xf32>
    %44 = vector.extract_strided_slice %4 {offsets = [4, 4, 0], sizes = [16, 16, 4], strides = [1, 1, 1]} : vector<20x20x4xbf16> to vector<16x16x4xbf16>
    %45 = vector.shape_cast %44 : vector<16x16x4xbf16> to vector<256x4xbf16>
    %c32 = arith.constant 32 : index
    %c0_18 = arith.constant 0 : index
    %46 = vector.load %arg3[%c32, %c0_18] : memref<36x128xbf16, #tpu.memory_space<vmem>>, vector<4x128xbf16>
    %cst_19 = arith.constant dense<0.000000e+00> : vector<256x128xf32>
    %47 = tpu.matmul %45, %46, %cst_19 {dimension_numbers = #tpu.dot_dimension_numbers<[1], [0], [0], [1], [0, 0, 1, 1], [], []>} : vector<256x4xbf16>, vector<4x128xbf16>, vector<256x128xf32> -> vector<256x128xf32>
    %48 = arith.addf %43, %47 : vector<256x128xf32>
    %cst_20 = arith.constant dense<0.000000e+00> : vector<128xf32>
    %49 = vector.multi_reduction <add>, %48, %cst_20 [0] : vector<256x128xf32> to vector<128xf32>
    %50 = vector.shape_cast %49 : vector<128xf32> to vector<1x1x1x128xf32>
    %c0_21 = arith.constant 0 : index
    %c0_22 = arith.constant 0 : index
    %c0_23 = arith.constant 0 : index
    %c0_24 = arith.constant 0 : index
    %51 = vector.load %arg4[%c0_21, %c0_22, %c0_23, %c0_24] : memref<1x1x1x128xf32, #tpu.memory_space<vmem>>, vector<1x1x1x128xf32>
    tpu.vector_store %arg4[%c0_21, %c0_22, %c0_23, %c0_24], %50 {strides = array<i32>} : memref<1x1x1x128xf32, #tpu.memory_space<vmem>>, vector<1x1x1x128xf32>,
    %52 = arith.mulf %48, %48 : vector<256x128xf32>
    %cst_25 = arith.constant dense<0.000000e+00> : vector<128xf32>
    %53 = vector.multi_reduction <add>, %52, %cst_25 [0] : vector<256x128xf32> to vector<128xf32>
    %54 = vector.shape_cast %53 : vector<128xf32> to vector<1x1x1x128xf32>
    %c0_26 = arith.constant 0 : index
    %c0_27 = arith.constant 0 : index
    %c0_28 = arith.constant 0 : index
    %c0_29 = arith.constant 0 : index
    %55 = vector.load %arg5[%c0_26, %c0_27, %c0_28, %c0_29] : memref<1x1x1x128xf32, #tpu.memory_space<vmem>>, vector<1x1x1x128xf32>
    tpu.vector_store %arg5[%c0_26, %c0_27, %c0_28, %c0_29], %54 {strides = array<i32>} : memref<1x1x1x128xf32, #tpu.memory_space<vmem>>, vector<1x1x1x128xf32>,
    return
  }
  func.func @transform_0(%arg0: i32, %arg1: i32) -> (i32, i32, i32, i32) {
    %c0_i32 = arith.constant 0 : i32
    %c0_i32_0 = arith.constant 0 : i32
    %c0_i32_1 = arith.constant 0 : i32
    %c0_i32_2 = arith.constant 0 : i32
    return %arg0, %c0_i32, %c0_i32_0, %c0_i32_1 : i32, i32, i32, i32
  }
  func.func @transform_1(%arg0: i32, %arg1: i32) -> (i32, i32) {
    %c0_i32 = arith.constant 0 : i32
    %c0_i32_0 = arith.constant 0 : i32
    %c0_i32_1 = arith.constant 0 : i32
    return %c0_i32, %c0_i32_0 : i32, i32
  }
  func.func @transform_2(%arg0: i32, %arg1: i32) -> (i32, i32, i32, i32) {
    %c0_i32 = arith.constant 0 : i32
    %c0_i32_0 = arith.constant 0 : i32
    %c0_i32_1 = arith.constant 0 : i32
    return %arg0, %arg1, %c0_i32, %c0_i32_0 : i32, i32, i32, i32
  }
  func.func @transform_3(%arg0: i32, %arg1: i32) -> (i32, i32, i32, i32) {
    %c0_i32 = arith.constant 0 : i32
    %c0_i32_0 = arith.constant 0 : i32
    %c0_i32_1 = arith.constant 0 : i32
    return %arg0, %arg1, %c0_i32, %c0_i32_0 : i32, i32, i32, i32
  }
}

</mosaic_0001>

<bundles_post_ra>
// kernel: tpu_custom_call.1
= control target key start
LH: loop header
LB: loop body
LE: loop exit
PB: predicated region body
PF: predicated region fallthrough
CT: control target
= control target key end

     0   :  { %9 = vsyncpa [#allocation3], 0  ;;  %s5275_s0 = inlined_call_operand.vmem [shape: bf16[2,20,20,4], index: 0, kind: input, shape index: {}]   ;;  %s5276_s1 = inlined_call_operand.vmem [shape: bf16[36,128], index: 1, kind: input, shape index: {}]   ;;  %s5277_s2 = inlined_call_operand.hbm [shape: f32[2,1,1,128], index: 2, kind: output, shape index: {0}]   ;;  %s5278_s3 = inlined_call_operand.hbm [shape: f32[2,1,1,128], index: 3, kind: output, shape index: {1}]  }
   0x1   :  { %11 = vsyncpa [#allocation3 + $0x1], 0 }
   0x2   :  { %12 = vsyncpa [#allocation5], 0 }
   0x3   :  { %14 = vsyncpa [#allocation5 + $0x1], 0  ;;  %s4131_s12 = smov 0   ;;  %s4133_s13 = smov 0  }
   0x4   :  { %s4135_s14 = smov 0   ;;  %s4137_s15 = smov 0  }
   0x5   :  { %s4139_s16 = smov 0   ;;  %s4141_s17 = smov 0  }
   0x6 LB: > { %s2927_s18 = sadd.s32 4294967295, %s4107_s17   ;;  %s2928_s19 = sadd.s32 4294967294, %s4107_s17   ;;  %s4107_s17 = sphi %s4141_s17, %s20_s17   ;;  %s4103_s16 = sphi %s4139_s16, %s5354_s16   ;;  %s4099_s15 = sphi %s4137_s15, %s5353_s15   ;;  %s4095_s14 = sphi %s4135_s14, %s5352_s14   ;;  %s4091_s13 = sphi %s4133_s13, %s5351_s13   ;;  %s4087_s12 = sphi %s4131_s12, %s5350_s12  }
   0x7   : > { %s32_s20 = sadd.s32 1, %s4103_s16  ;;  %s88_s21 = sadd.s32 1, %s4095_s14 }
   0x8   : > { %p34_p0 = scmp.ge.s32.totalorder %s32_s20, 2  ;;  %p98_p1 = scmp.ne.s32.totalorder %s4095_s14, %s4091_s13 }
   0x9   : > { %p99_p2 = scmp.eq.s32.totalorder %s2927_s18, 1  ;;  %p104_p3 = scmp.ne.s32.totalorder %s4091_s13, %s4087_s12 }
   0xa   : > { %s5356_s20 = smov (%p34_p0, %s32_s20), 0  ;;  %p105_p5 = scmp.eq.s32.totalorder %s2928_s19, 1 }
   0xb   : > { %p4171_p4 = por %p99_p2, %p98_p1  ;;  %s83_s23 = ssub.s32 %s4103_s16, %s5356_s20 }
   0xc   : > { %p2931_p6 = scmp.ge.s32.totalorder %s4107_s17, 1  ;;  %p86_p7 = scmp.eq.s32.totalorder %s83_s23, 0 }
   0xd   : > { %p4178_p8 = por %p105_p5, %p104_p3  ;;  %p162_p9 = scmp.lt.s32.totalorder %s4107_s17, 3 }
   0xe   : > { %s4184_s25 = scalar_select %p86_p7, %s4095_s14, %s88_s21  }
   0xf   : > { %p163_p10 = pnand %p2931_p6, %p162_p9 }
  0x11   : > { %166 = sbr.rel (%p163_p10) target bundleno = 598 (0x256), region = 28 }
  0x18   : > { %v3973_v0 = vld [vmem:[%s5276_s1] ss:$0 sps:$4 sm:$0xcc]   ;;  %vm525_vm0 = vcmask 1041408   ;;  %v4192_v1 = vld [vmem:[%s5276_s1 + $0x8] sm:$0x3] }
  0x19   : > { %5303 = vst [vmem:[#allocation8_spill] sm:$0xff] %v4192_v1  ;;  %p189_p11 = scmp.lt.s32.totalorder %s4099_s15, 1  ;;  %v475_v2 = vrot.slane %v3973_v0, 2  ;;  %3906 = vmatprep.subr.msk.bf16.mxu0 %vm525_vm0, %v4192_v1  ;;  %v4199_v3 = vsel %vm525_vm0, %v4192_v1, 0  ;;  %v259_v4 = vld [vmem:[%s5276_s1] sm:$0x3] }
  0x1a   : > { %5304 = vst [vmem:[#allocation9_spill] sm:$0xff] %v4199_v3  ;;  %3475 = vmatpush3.bf16.msra.mxu0 %v4199_v3  ;;  %v3974_v5 = vld [vmem:[%s5276_s1 + $0x8] ss:$0 sps:$4 sm:$0xcc]   ;;  %vm308_vm1 = vcmask 1042432   ;;  %vm309_vm2 = vcmask 1046532  }
  0x1b   : > { %s190_s5 = scalar_select %p189_p11, %s4099_s15, 1  ;;  %3902 = vmatprep.subr.msk.bf16.mxu1 %vm525_vm0, %v475_v2  ;;  %v527_v6 = vsel %vm525_vm0, %v475_v2, 0  ;;  %v1824_v7 = vrot.slane %v3974_v5, 2  ;;  %vm4217_vm3 = vmor %vm308_vm1, %vm309_vm2  ;;  %vm476_vm4 = vcmask 31744   ;;  %v787_v48 = vsel %vm525_vm0, %v259_v4, 0 }
  0x1c   : > { %3339 = vmatpush3.bf16.msra.mxu1 %v527_v6  ;;  %v4307_v53 = vld [vmem:[%s5276_s1 + $0x4] sm:$0x3]  ;;  %vm951_vm5 = vcmask 1045508   ;;  %s3181_s6 = sshll.u32 %s4099_s15, 4  ;;  %s4109_s28 = smov [#allocation2]  }
  0x1d   : > { %s3912_s8 = smul.u32 240, %s190_s5  ;;  %3903 = vmatprep.subr.msk.bf16.mxu1 %vm525_vm0, %v259_v4  ;;  %3908 = vmatprep.subr.msk.bf16.mxu0 %vm525_vm0, %v1824_v7  ;;  %5307 = vst [vmem:[#allocation10_spill] sm:$0xff] %v4307_v53  ;;  %v1832_v55 = vsel %vm525_vm0, %v1824_v7, 0  ;;  %vm4430_vm6 = vmor %vm525_vm0, %vm951_vm5  ;;  %s5186_s5 = sand.u32 1, %s4091_s13  }
  0x1e   : > { %s182_s7 = scalar_lea.vmem [#allocation2], %s5186_s5  ;;  %s188_s9 = scalar_lea.vmem [#allocation4], %s5186_s5 }
  0x1f   : > { %s4215_s11 = scalar_lea.vmem %s5275_s0, %s3912_s8  ;;  %s2818_s8 = sshll.u32 %s182_s7, 4  ;;  %s5198_s8 = int_to_ptr.vmem [resolvable:$true] %s2818_s8 }
  0x20   : > { %v4223_v9 = vld [vmem:[%s4215_s11] sm:$0xf]  ;;  %v4226_v10 = vld [vmem:[%s4215_s11 + $0x4] sm:$0xf]  ;;  %v4229_v11 = vld [vmem:[%s4215_s11 + $0x8] sm:$0x3]  ;;  %s5196_s19 = scalar_lea.hbm %s5277_s2, %s3181_s6  ;;  %s5203_s23 = scalar_lea.hbm %s5278_s3, %s3181_s6 }
  0x21   : > { %v2933_v12 = vrot.slane %v4223_v9, 9  ;;  %v313_v13 = vrot.slane %v4226_v10, 5  ;;  %v316_v14 = vrot.slane %v4229_v11, 5  ;;  %v4235_v15 = vld [vmem:[%s4215_s11 + $0x18] sm:$0xf]  ;;  %s2832_s10 = sshll.u32 %s188_s9, 4  ;;  %s5205_s10 = int_to_ptr.vmem [resolvable:$true] %s2832_s10 }
  0x22   : > { %v4238_v16 = vld [vmem:[%s4215_s11 + $0x1c] sm:$0xf]  ;;  %v4241_v17 = vld [vmem:[%s4215_s11 + $0x20] sm:$0x3]  ;;  %v2935_v21 = vrot.slane %v4235_v15, 9  ;;  %s2801_s26 = scalar_lea.sflag [#allocation3], %s5186_s5 }
  0x23   : > { %v314_v19 = vsel %vm4217_vm3, %v2933_v12, %v313_v13  ;;  %v315_v20 = vrot.slane %v313_v13, 4  ;;  %v327_v22 = vrot.slane %v4238_v16, 5  ;;  %v4250_v23 = vld [vmem:[%s4215_s11 + $0xc] sm:$0xf]  ;;  %v330_v24 = vrot.slane %v4241_v17, 5  ;;  %s3997_s27 = scalar_lea.vmem %s5198_s8, 16 }
  0x24   : > { %v4254_v25 = vld [vmem:[%s4215_s11 + $0x10] sm:$0xf]  ;;  %v4261_v29 = vld [vmem:[%s4215_s11 + $0x14] sm:$0x3]  ;;  %v2934_v30 = vrot.slane %v4250_v23, 9  ;;  %p3998_p12 = scmp.ne.s32.totalorder %s5198_s8, %s3997_s27  ;;  %s4001_s29 = sshll.u32 %s4109_s28, 4  ;;  %s4002_s29 = int_to_ptr.vmem [resolvable:$false] %s4001_s29 }
  0x25   : > { %v317_v26 = vsel %vm4217_vm3, %v315_v20, %v316_v14  ;;  %v328_v27 = vsel %vm4217_vm3, %v2935_v21, %v327_v22  ;;  %v329_v28 = vrot.slane %v327_v22, 4  ;;  %v4265_v31 = vld [vmem:[%s4215_s11 + $0x24] sm:$0xf]  ;;  %v320_v33 = vrot.slane %v4254_v25, 5  ;;  %v4270_v35 = vld [vmem:[%s4215_s11 + $0x28] sm:$0xf]  ;;  %p4004_p1 = scmp.lt.s32.totalorder %s5198_s8, %s4002_s29 }
  0x26   : > { %v2949_v32 = vcombine.low %v314_v19, %v317_v26  ;;  %v323_v34 = vrot.slane %v4261_v29, 5  ;;  %v4275_v37 = vld [vmem:[%s4215_s11 + $0x2c] sm:$0x3]  ;;  %v2936_v38 = vrot.slane %v4265_v31, 9  ;;  %v334_v42 = vrot.slane %v4270_v35, 5  ;;  %p3999_p13 = pnand %p3998_p12, %p4171_p4  ;;  %s4003_s30 = scalar_lea.vmem %s4002_s29, 32 }
  0x27   : > { %v331_v36 = vsel %vm4217_vm3, %v329_v28, %v330_v24  ;;  %v321_v40 = vsel %vm4217_vm3, %v2934_v30, %v320_v33  ;;  %v322_v41 = vrot.slane %v320_v33, 4  ;;  %v4283_v43 = vld [vmem:[%s4215_s11 + $0x30] sm:$0xf]  ;;  %v4286_v44 = vld [vmem:[%s4215_s11 + $0x34] sm:$0xf]  ;;  %v337_v45 = vrot.slane %v4275_v37, 5  ;;  %p4005_p2 = scmp.lt.s32.totalorder %s4003_s30, %s3997_s27 }
  0x28   : > { %3340 = vmatprep.mubr.msk.bf16.mxu1 %vm476_vm4, %v2949_v32  ;;  %v2951_v39 = vcombine.low %v328_v27, %v331_v36  ;;  %v4290_v46 = vld [vmem:[%s4215_s11 + $0x38] sm:$0x3]  ;;  %v335_v49 = vsel %vm4217_vm3, %v2936_v38, %v334_v42  ;;  %v336_v50 = vrot.slane %v334_v42, 4  ;;  %v4299_v51 = vld [vmem:[%s4215_s11 + $0x3c] sm:$0xf]  ;;  %v2937_v56 = vrot.slane %v4283_v43, 9  ;;  %p4000_p0 = pneg %p3999_p13 }
  0x29   : > { %v324_v47 = vsel %vm4217_vm3, %v322_v41, %v323_v34  ;;  %v4302_v52 = vld [vmem:[%s4215_s11 + $0x40] sm:$0xf]  ;;  %v341_v57 = vrot.slane %v4286_v44, 5  ;;  %v4313_v58 = vld [vmem:[%s4215_s11 + $0x44] sm:$0x3]  ;;  %v344_v60 = vrot.slane %v4290_v46, 5  ;;  %p4006_p3 = por %p4005_p2, %p4004_p1 }
  0x2a   : > { %3476 = vmatprep.mubr.msk.bf16.mxu0 %vm476_vm4, %v2951_v39  ;;  %v2950_v54 = vcombine.low %v321_v40, %v324_v47  ;;  %v338_v59 = vsel %vm4217_vm3, %v336_v50, %v337_v45  ;;  %v2938_v61 = vrot.slane %v4299_v51, 9  ;;  %v348_v62 = vrot.slane %v4302_v52, 5  ;;  %v4321_v63 = vld [vmem:[%s4215_s11 + $0x48] sm:$0xf]  ;;  %v4328_v6 = vld [vmem:[%s4215_s11 + $0x4c] sm:$0xf] }
  0x2b   : > { %v2952_v0 = vcombine.low %v335_v49, %v338_v59  ;;  %v342_v2 = vsel %vm4217_vm3, %v2937_v56, %v341_v57  ;;  %v343_v4 = vrot.slane %v341_v57, 4  ;;  %v351_v5 = vrot.slane %v4313_v58, 5  ;;  %v4331_v7 = vld [vmem:[%s4215_s11 + $0x50] sm:$0x3]  ;;  %v4339_v19 = vld [vmem:[%s5276_s1 + $0xc] sm:$0x3]  ;;  %p4007_p5 = pnand %p4006_p3, %p4000_p0 }
  0x2c   : > { %3341 = vmatmul.mubr.msk.bf16.vlgmr.msra.gmra.mrb[0].mxu1 %vm476_vm4, %v2950_v54  ;;  %v350_v12 = vrot.slane %v348_v62, 4  ;;  %v2939_v13 = vrot.slane %v4321_v63, 9  ;;  %v355_v14 = vrot.slane %v4328_v6, 5  ;;  %v358_v21 = vrot.slane %v4331_v7, 5  ;;  %v4346_v22 = vld [vmem:[%s4215_s11 + $0x58] sm:$0xf] }
  0x2d   : > { %3373 = vmatpush3.bf16.msra.mxu1 %v787_v48  ;;  %3344 = vmatprep.mubr.msk.bf16.mxu1 %vm476_vm4, %v2951_v39  ;;  %v345_v20 = vsel %vm4217_vm3, %v343_v4, %v344_v60  ;;  %v349_v26 = vsel %vm4217_vm3, %v2938_v61, %v348_v62  ;;  %v4357_v30 = vld [vmem:[%s4215_s11 + $0x64] sm:$0xf]  ;;  %v4362_v33 = vld [vmem:[%s4215_s11 + $0x54] sm:$0xf]  ;;  %v4365_v34 = vld [vmem:[%s4215_s11 + $0x5c] sm:$0x3] }
  0x2e   : > { %3477 = vmatmul.mubr.msk.bf16.vlgmr.msra.gmra.mrb[0].mxu0 %vm476_vm4, %v2952_v0  ;;  %3904 = vmatprep.subr.msk.bf16.mxu1 %vm525_vm0, %v4307_v53  ;;  %v4350_v24 = vcombine.low %v342_v2, %v345_v20  ;;  %v352_v27 = vsel %vm4217_vm3, %v350_v12, %v351_v5  ;;  %v357_v28 = vrot.slane %v355_v14, 4  ;;  %v356_v32 = vsel %vm4217_vm3, %v2939_v13, %v355_v14  ;;  %v4375_v39 = vld [vmem:[%s4215_s11 + $0x60] sm:$0xf]  ;;  %v4378_v40 = vld [vmem:[%s4215_s11 + $0x68] sm:$0x3] }
  0x2f   : > { %3509 = vmatpush3.bf16.msra.mxu0 %v1832_v55  ;;  %v362_v36 = vrot.slane %v4346_v22, 5  ;;  %v369_v41 = vrot.slane %v4357_v30, 5  ;;  %v4381_v42 = vcombine.low %v349_v26, %v352_v27  ;;  %v2940_v47 = vrot.slane %v4362_v33, 9  ;;  %v4391_v56 = vld [vmem:[%s4215_s11 + $0x70] sm:$0xf] }
  0x30   : > { %5308 = vst [vmem:[#allocation11_spill] sm:$0xff] %v4350_v24  ;;  %3909 = vmatprep.subr.msk.bf16.mxu0 %vm525_vm0, %v4339_v19  ;;  %3480 = vmatprep.mubr.msk.bf16.mxu0 %vm476_vm4, %v4350_v24  ;;  %v359_v38 = vsel %vm4217_vm3, %v357_v28, %v358_v21  ;;  %v365_v49 = vrot.slane %v4365_v34, 5  ;;  %v2941_v50 = vrot.slane %v4375_v39, 9  ;;  %v372_v55 = vrot.slane %v4378_v40, 5  ;;  %v4410_v2 = vld [vmem:[%s4215_s11 + $0x6c] sm:$0xf] }
  0x31   : > { %5309 = vst [vmem:[#allocation12_spill] sm:$0xff] %v4381_v42  ;;  %v4383_v45 = vcombine.low %v356_v32, %v359_v38  ;;  %v364_v48 = vrot.slane %v362_v36, 4  ;;  %v371_v54 = vrot.slane %v369_v41, 4  ;;  %v363_v57 = vsel %vm4217_vm3, %v2940_v47, %v362_v36  ;;  %v4413_v4 = vld [vmem:[%s4215_s11 + $0x74] sm:$0x3] }
  0x32   : > { %v376_v60 = vrot.slane %v4391_v56, 5  ;;  %v969_v61 = vrot.slane %v4238_v16, 6  ;;  %v370_v62 = vsel %vm4217_vm3, %v2941_v50, %v369_v41  ;;  %v2942_v13 = vrot.slane %v4410_v2, 9  ;;  %v4422_v21 = vld [vmem:[%s4215_s11 + $0x7c] sm:$0xf] }
  0x33   : > { %5310 = vst [vmem:[#allocation13_spill] sm:$0xff] %v4383_v45  ;;  %v366_v59 = vsel %vm4217_vm3, %v364_v48, %v365_v49  ;;  %v379_v20 = vrot.slane %v4413_v4, 5  ;;  %v3016_v26 = vrot.slane %v4235_v15, 10  ;;  %v972_v27 = vrot.slane %v4241_v17, 6  ;;  %v4439_v38 = vld [vmem:[%s4215_s11 + $0x78] sm:$0xf] }
  0x34   : > { %3345 = vmatmul.mubr.msk.bf16.gmra.mrb[4].mxu1 %vm476_vm4, %v2952_v0  ;;  %v373_v0 = vsel %vm4217_vm3, %v371_v54, %v372_v55  ;;  %v4415_v5 = vcombine.low %v363_v57, %v366_v59  ;;  %v378_v14 = vrot.slane %v376_v60, 4  ;;  %v976_v28 = vrot.slane %v4270_v35, 6  ;;  %v4442_v17 = vld [vmem:[%s4215_s11 + $0x80] sm:$0x3]  ;;  %v4454_v54 = vld [vmem:[%s4215_s11 + $0x88] sm:$0xf] }
  0x35   : > { %3348 = vmatprep.mubr.msk.bf16.mxu1 %vm476_vm4, %v4350_v24  ;;  %v4417_v12 = vcombine.low %v370_v62, %v373_v0  ;;  %v971_v32 = vrot.slane %v969_v61, 4  ;;  %v383_v41 = vrot.slane %v4422_v21, 5  ;;  %v3017_v47 = vrot.slane %v4265_v31, 10  ;;  %v4473_v3 = vld [vmem:[%s4215_s11 + $0x8c] sm:$0x3] }
  0x36   : > { %3481 = vmatmul.mubr.msk.bf16.gmra.mrb[4].mxu0 %vm476_vm4, %v4381_v42  ;;  %5311 = vst [vmem:[#allocation14_spill] sm:$0xff] %v4415_v5  ;;  %v377_v48 = vsel %vm4217_vm3, %v2942_v13, %v376_v60  ;;  %v380_v49 = vsel %vm4217_vm3, %v378_v14, %v379_v20  ;;  %v983_v50 = vrot.slane %v4286_v44, 6  ;;  %v978_v55 = vrot.slane %v976_v28, 4  ;;  %v4464_v13 = vld [vmem:[%s4215_s11 + $0x84] sm:$0xf]  ;;  %5317 = vst [vmem:[#allocation18_spill] sm:$0xff] %v4473_v3 }
  0x37   : > { %3484 = vmatprep.mubr.msk.bf16.mxu0 %vm476_vm4, %v4383_v45  ;;  %5312 = vst [vmem:[#allocation15_spill] sm:$0xff] %v4417_v12  ;;  %v979_v57 = vrot.slane %v4275_v37, 6  ;;  %v970_v59 = vsel %vm4430_vm6, %v3016_v26, %v969_v61  ;;  %v973_v62 = vsel %vm4430_vm6, %v971_v32, %v972_v27  ;;  %v2943_v0 = vrot.slane %v4439_v38, 9  ;;  %v4467_v14 = vld [vmem:[%s4215_s11 + $0x94] sm:$0xf] }
  0x38   : > { %v386_v60 = vrot.slane %v4442_v17, 5  ;;  %5315 = vst [vmem:[#allocation16_spill] sm:$0xff] %v4467_v14  ;;  %v4469_v20 = vcombine.low %v377_v48, %v380_v49  ;;  %v385_v18 = vrot.slane %v383_v41, 4  ;;  %v3018_v37 = vrot.slane %v4283_v43, 10  ;;  %v4485_v49 = vld [vmem:[%s4215_s11 + $0x90] sm:$0xf] }
  0x39   : > { %v390_v61 = vrot.slane %v4454_v54, 5  ;;  %v4476_v26 = vcombine.low %v970_v59, %v973_v62  ;;  %v985_v27 = vrot.slane %v983_v50, 4  ;;  %v986_v32 = vrot.slane %v4290_v46, 6  ;;  %5319 = vst [vmem:[#allocation20_spill] sm:$0xff] %v4485_v49  ;;  %v4497_v24 = vld [vmem:[%s4215_s11 + $0x98] sm:$0x3] }
  0x3a   : > { %5316 = vst [vmem:[#allocation17_spill] sm:$0xff] %v4469_v20  ;;  %v977_v48 = vsel %vm4430_vm6, %v3017_v47, %v976_v28  ;;  %v980_v59 = vsel %vm4430_vm6, %v978_v55, %v979_v57  ;;  %v384_v46 = vsel %vm4217_vm3, %v2943_v0, %v383_v41  ;;  %v2944_v62 = vrot.slane %v4464_v13, 9  ;;  %5320 = vst [vmem:[#allocation21_spill] sm:$0xff] %v4497_v24  ;;  %v4513_v53 = vld [vmem:[%s4215_s11 + $0xa0] sm:$0xf] }
  0x3b   : > { %5318 = vst [vmem:[#allocation19_spill] sm:$0xff] %v4476_v26  ;;  %v387_v28 = vsel %vm4217_vm3, %v385_v18, %v386_v60  ;;  %v984_v47 = vsel %vm4430_vm6, %v3018_v37, %v983_v50  ;;  %v3019_v55 = vrot.slane %v4299_v51, 10  ;;  %v987_v41 = vsel %vm4430_vm6, %v985_v27, %v986_v32 }
  0x3c   : > { %3349 = vmatmul.mubr.msk.bf16.gmra.mrb[8].mxu1 %vm476_vm4, %v4381_v42  ;;  %v397_v42 = vrot.slane %v4467_v14, 5  ;;  %v993_v0 = vrot.slane %v4313_v58, 6  ;;  %v2945_v1 = vrot.slane %v4485_v49, 9  ;;  %v2045_v18 = vsel %vm525_vm0, %v4339_v19, 0 }
  0x3d   : > { %3352 = vmatprep.mubr.msk.bf16.mxu1 %vm476_vm4, %v4383_v45  ;;  %v990_v45 = vrot.slane %v4302_v52, 6  ;;  %v400_v60 = vrot.slane %v4497_v24, 5  ;;  %v997_v37 = vrot.slane %v4328_v6, 6  ;;  %v4521_v32 = vcombine.low %v977_v48, %v980_v59 }
  0x3e   : > { %3485 = vmatmul.mubr.msk.bf16.gmra.mrb[8].mxu0 %vm476_vm4, %v4415_v5  ;;  %v399_v50 = vrot.slane %v397_v42, 4  ;;  %v4523_v58 = vcombine.low %v384_v46, %v387_v28  ;;  %v4528_v49 = vcombine.low %v984_v47, %v987_v41  ;;  %v391_v19 = vsel %vm4217_vm3, %v2944_v62, %v390_v61  ;;  %v4543_v28 = vld [vmem:[%s4215_s11 + $0xa4] sm:$0x3] }
  0x3f   : > { %3488 = vmatprep.mubr.msk.bf16.mxu0 %vm476_vm4, %v4417_v12  ;;  %v992_v57 = vrot.slane %v990_v45, 4  ;;  %v404_v14 = vrot.slane %v4513_v53, 5  ;;  %v398_v59 = vsel %vm4217_vm3, %v2945_v1, %v397_v42  ;;  %v3020_v46 = vrot.slane %v4321_v63, 10  ;;  %v4586_v1 = vld [vmem:[%s4215_s11 + $0xb8] sm:$0xf] }
  0x40   : > { %5321 = vst [vmem:[#allocation22_spill] sm:$0xff] %v4523_v58  ;;  %v1004_v47 = vrot.slane %v4346_v22, 6  ;;  %v407_v41 = vrot.slane %v4543_v28, 5  ;;  %v1011_v27 = vrot.slane %v4357_v30, 6 }
  0x41   : > { %v994_v48 = vsel %vm4430_vm6, %v992_v57, %v993_v0  ;;  %v4566_v57 = vld [vmem:[%s4215_s11 + $0xa8] sm:$0xf] }
  0x44   : > { %3353 = vmatmul.mubr.msk.bf16.gmra.mrb[12].mxu1 %vm476_vm4, %v4415_v5  ;;  %v393_v5 = vrot.slane %v4473_v3, 5  ;;  %v4526_v3 = vld [vmem:[%s4215_s11 + $0x9c] sm:$0xf] }
  0x45   : > { %3356 = vmatprep.mubr.msk.bf16.mxu1 %vm476_vm4, %v4417_v12  ;;  %v392_v12 = vrot.slane %v390_v61, 4  ;;  %v4546_v61 = vld [vmem:[%s4215_s11 + $0xac] sm:$0xf]  ;;  %v2946_v62 = vrot.slane %v4526_v3, 9 }
  0x46   : > { %3489 = vmatmul.mubr.msk.bf16.gmra.mrb[12].mxu0 %vm476_vm4, %v4469_v20  ;;  %v411_v0 = vrot.slane %v4546_v61, 5 }
  0x47   : > { %3510 = vmatprep.mubr.msk.bf16.mxu0 %vm476_vm4, %v4476_v26  ;;  %v394_v24 = vsel %vm4217_vm3, %v392_v12, %v393_v5  ;;  %v991_v26 = vsel %vm4430_vm6, %v3019_v55, %v990_v45  ;;  %v401_v5 = vsel %vm4217_vm3, %v399_v50, %v400_v60  ;;  %v999_v45 = vrot.slane %v997_v37, 4  ;;  %v4582_v55 = vld [vmem:[%s4215_s11 + $0xb0] sm:$0x3] }
  0x48   : > { %v1000_v12 = vrot.slane %v4331_v7, 6  ;;  %v4557_v42 = vcombine.low %v391_v19, %v394_v24  ;;  %v406_v7 = vrot.slane %v404_v14, 4  ;;  %v4571_v24 = vcombine.low %v4235_v15, %v4238_v16 }
  0x49   : > { %v4575_v50 = vcombine.low %v991_v26, %v994_v48  ;;  %v4577_v60 = vcombine.low %v398_v59, %v401_v5  ;;  %v998_v19 = vsel %vm4430_vm6, %v3020_v46, %v997_v37  ;;  %v405_v16 = vsel %vm4217_vm3, %v2946_v62, %v404_v14 }
  0x4a   : > { %v1001_v15 = vsel %vm4430_vm6, %v999_v45, %v1000_v12  ;;  %v3021_v26 = vrot.slane %v4362_v33, 10  ;;  %v1006_v37 = vrot.slane %v1004_v47, 4  ;;  %v1007_v48 = vrot.slane %v4365_v34, 6  ;;  %v4607_v12 = vld [vmem:[%s4215_s11 + $0xb4] sm:$0xf] }
  0x4b   : > { %5322 = vst [vmem:[#allocation23_spill] sm:$0xff] %v4577_v60  ;;  %v2947_v59 = vrot.slane %v4566_v57, 9  ;;  %v4601_v46 = vcombine.low %v4283_v43, %v4286_v44  ;;  %v408_v5 = vsel %vm4217_vm3, %v406_v7, %v407_v41  ;;  %v413_v14 = vrot.slane %v411_v0, 4 }
  0x4c   : > { %3357 = vmatmul.mubr.msk.bf16.gmra.mrb[16].mxu1 %vm476_vm4, %v4469_v20  ;;  %v414_v45 = vrot.slane %v4582_v55, 5  ;;  %v3022_v34 = vrot.slane %v4375_v39, 10  ;;  %v1013_v62 = vrot.slane %v1011_v27, 4  ;;  %v4615_v20 = vld [vmem:[%s4215_s11 + $0xbc] sm:$0x3]  ;;  %v3015_v43 = vrot.slane %v4250_v23, 10 }
  0x4d   : > { %3360 = vmatprep.mubr.msk.bf16.mxu1 %vm476_vm4, %v4523_v58  ;;  %v1014_v58 = vrot.slane %v4378_v40, 6  ;;  %v5323_v44 = vrot.slane %v4254_v25, 6  ;;  %v965_v41 = vrot.slane %v4261_v29, 6  ;;  %v4629_v40 = vcombine.low %v405_v16, %v408_v5 }
  0x4e   : > { %3511 = vmatmul.mubr.msk.bf16.vlgmr.msra.gmra.mrb[0].mxu0 %vm476_vm4, %v4521_v32  ;;  %v2948_v29 = vrot.slane %v4607_v12, 9  ;;  %v421_v16 = vrot.slane %v4615_v20, 5  ;;  %v3023_v5 = vrot.slane %v4410_v2, 10 }
  0x4f   : > { %3543 = vmatpush3.bf16.msra.mxu0 %v2045_v18  ;;  %3514 = vmatprep.mubr.msk.bf16.mxu0 %vm476_vm4, %v4528_v49  ;;  %v4595_v18 = vcombine.low %v4265_v31, %v4270_v35  ;;  %v418_v31 = vrot.slane %v4586_v1, 5  ;;  %v4610_v35 = vcombine.low %v998_v19, %v1001_v15  ;;  %v964_v7 = vrot.slane %v5323_v44, 4 }
  0x50   : > { %v4625_v19 = vcombine.low %v4299_v51, %v4302_v52  ;;  %v1005_v15 = vsel %vm4430_vm6, %v3021_v26, %v1004_v47  ;;  %v1008_v44 = vsel %vm4430_vm6, %v1006_v37, %v1007_v48  ;;  %v412_v51 = vsel %vm4217_vm3, %v2947_v59, %v411_v0  ;;  %v4646_v47 = vld [vmem:[%s5276_s1 + $0xc] ss:$0 sps:$4 sm:$0xcc]  }
  0x51   : > { %v415_v52 = vsel %vm4217_vm3, %v413_v14, %v414_v45  ;;  %v1012_v26 = vsel %vm4430_vm6, %v3022_v34, %v1011_v27  ;;  %v1015_v0 = vsel %vm4430_vm6, %v1013_v62, %v1014_v58  ;;  %v1018_v37 = vrot.slane %v4391_v56, 6 }
  0x52   : > { %v4657_v48 = vcombine.low %v4321_v63, %v4328_v6  ;;  %v4659_v59 = vcombine.low %v1005_v15, %v1008_v44  ;;  %v1025_v14 = vrot.slane %v4422_v21, 6  ;;  %v4665_v45 = vcombine.low %v4362_v33, %v4346_v22 }
  0x53   : > { %v4667_v27 = vcombine.low %v412_v51, %v415_v52  ;;  %v419_v58 = vsel %vm4217_vm3, %v2948_v29, %v418_v31  ;;  %v1021_v34 = vrot.slane %v4413_v4, 6  ;;  %v3024_v63 = vrot.slane %v4439_v38, 10 }
  0x54   : > { %3361 = vmatmul.mubr.msk.bf16.gmra.mrb[20].mxu1 %vm476_vm4, %v4557_v42  ;;  %v4673_v6 = vcombine.low %v1012_v26, %v1015_v0  ;;  %v4679_v15 = vcombine.low %v4375_v39, %v4357_v30  ;;  %v5300_v22 = vrot.slane %v4646_v47, 2  ;;  %v1020_v33 = vrot.slane %v1018_v37, 4 }
  0x55   : > { %3364 = vmatprep.mubr.msk.bf16.mxu1 %vm476_vm4, %v4577_v60  ;;  %v420_v60 = vrot.slane %v418_v31, 4  ;;  %v4684_v44 = vcombine.low %v4410_v2, %v4391_v56  ;;  %v4688_v4 = vcombine.low %v4439_v38, %v4422_v21  ;;  %v4692_v31 = vcombine.low %v4464_v13, %v4454_v54  ;;  %v5324_v2 = vld [vmem:[#allocation16_spill] sm:$0xff] }
  0x56   : > { %3515 = vmatmul.mubr.msk.bf16.gmra.mrb[4].mxu0 %vm476_vm4, %v4575_v50  ;;  %v1019_v30 = vsel %vm4430_vm6, %v3023_v5, %v1018_v37  ;;  %v1027_v39 = vrot.slane %v1025_v14, 4  ;;  %v1028_v56 = vrot.slane %v4442_v17, 6  ;;  %3910 = vmatprep.subr.msk.bf16.mxu0 %vm525_vm0, %v5300_v22  ;;  %v5325_v21 = vld [vmem:[#allocation20_spill] sm:$0xff]  ;;  %v4715_v29 = vcombine.low %v4566_v57, %v4546_v61 }
  0x57   : > { %3518 = vmatprep.mubr.msk.bf16.mxu0 %vm476_vm4, %v4610_v35  ;;  %v422_v62 = vsel %vm4217_vm3, %v420_v60, %v421_v16  ;;  %v958_v60 = vrot.slane %v4229_v11, 6  ;;  %v4707_v38 = vcombine.low %v5325_v21, %v5324_v2  ;;  %v4711_v11 = vcombine.low %v4526_v3, %v4513_v53 }
  0x58   : > { %v4719_v17 = vcombine.low %v4607_v12, %v4586_v1  ;;  %v4723_v51 = vcombine.low %v419_v58, %v422_v62  ;;  %v1026_v52 = vsel %vm4430_vm6, %v3024_v63, %v1025_v14  ;;  %v5326_v16 = vrot.slane %v4226_v10, 6 }
  0x59   : > { %v5327_v26 = vrot.slane %v4223_v9, 10  ;;  %v1022_v58 = vsel %vm4430_vm6, %v1020_v33, %v1021_v34  ;;  %v1032_v62 = vrot.slane %v4454_v54, 6  ;;  %v5329_v14 = vrot.slane %v4254_v25, 6 }
  0x5a   : > { %v5328_v37 = vmov %v5326_v16  ;;  %v4763_v33 = vcombine.low %v1019_v30, %v1022_v58  ;;  %v1053_v58 = vrot.slane %v4546_v61, 6  ;;  %v3028_v61 = vrot.slane %v4566_v57, 10  ;;  %v4834_v57 = vld [vmem:[%s4215_s11 + $0xc0] sm:$0xf] }
  0x5b   : > { %v4733_v0 = vsel %vm4430_vm6, %v5327_v26, %v5326_v16  ;;  %v957_v5 = vrot.slane %v5328_v37, 4  ;;  %v4746_v63 = vsel %vm4430_vm6, %v3015_v43, %v5329_v14  ;;  %v4750_v16 = vsel %vm4430_vm6, %v964_v7, %v965_v41 }
  0x5c   : > { %3365 = vmatmul.mubr.msk.bf16.gmra.mrb[24].mxu1 %vm476_vm4, %v4629_v40  ;;  %v1029_v26 = vsel %vm4430_vm6, %v1027_v39, %v1028_v56  ;;  %v1039_v37 = vrot.slane %v5324_v2, 6  ;;  %v3025_v7 = vrot.slane %v4464_v13, 10  ;;  %v1034_v41 = vrot.slane %v1032_v62, 4  ;;  %v5330_v39 = vld [vmem:[#allocation18_spill] sm:$0xff] }
  0x5d   : > { %3368 = vmatprep.mubr.msk.bf16.mxu1 %vm476_vm4, %v4667_v27  ;;  %v4757_v34 = vsel %vm4430_vm6, %v957_v5, %v958_v60  ;;  %v4765_v14 = vcombine.low %v1026_v52, %v1029_v26  ;;  %v1035_v56 = vrot.slane %v5330_v39, 6  ;;  %v3026_v60 = vrot.slane %v5325_v21, 10  ;;  %v5331_v5 = vld [vmem:[#allocation21_spill] sm:$0xff]  ;;  %v4782_v13 = vld [vmem:[%s5276_s1 + $0x4] ss:$0 sps:$4 sm:$0xcc]  }
  0x5e   : > { %3519 = vmatmul.mubr.msk.bf16.gmra.mrb[8].mxu0 %vm476_vm4, %v4659_v59  ;;  %v1041_v2 = vrot.slane %v1039_v37, 4  ;;  %v1042_v54 = vrot.slane %v5331_v5, 6  ;;  %v5332_v43 = vcombine.low %v4223_v9, %v4226_v10  ;;  %v1033_v30 = vsel %vm4430_vm6, %v3025_v7, %v1032_v62  ;;  %v5333_v26 = vld [vmem:[#allocation10_spill] sm:$0xff]  ;;  %v249_v5 = vld [vmem:[%s4215_s11 + $0xc8] sm:$0x3] }
  0x5f   : > { %3522 = vmatprep.mubr.msk.bf16.mxu0 %vm476_vm4, %v4673_v6  ;;  %v1036_v21 = vsel %vm4430_vm6, %v1034_v41, %v1035_v56  ;;  %v1046_v9 = vrot.slane %v4513_v53, 6  ;;  %v1040_v10 = vsel %vm4430_vm6, %v3026_v60, %v1039_v37  ;;  %v5299_v62 = vrot.slane %v4782_v13, 2 }
  0x60   : > { %v1043_v52 = vsel %vm4430_vm6, %v1041_v2, %v1042_v54  ;;  %v4798_v39 = vcombine.low %v1033_v30, %v1036_v21  ;;  %v3027_v41 = vrot.slane %v4526_v3, 10  ;;  %v1049_v56 = vrot.slane %v4543_v28, 6  ;;  %v4812_v2 = vld [vmem:[%s4215_s11 + $0xc4] sm:$0xf] }
  0x61   : > { %v4801_v7 = vcombine.low %v1040_v10, %v1043_v52  ;;  %v1048_v53 = vrot.slane %v1046_v9, 4  ;;  %v5334_v37 = vcombine.low %v4250_v23, %v4254_v25  ;;  %v1055_v54 = vrot.slane %v1053_v58, 4 }
  0x62   : > { %v1056_v60 = vrot.slane %v4582_v55, 6  ;;  %v1060_v3 = vrot.slane %v4586_v1, 6  ;;  %v1047_v23 = vsel %vm4430_vm6, %v3027_v41, %v1046_v9  ;;  %v1802_v28 = vrot.slane %v4812_v2, 6  ;;  %v4847_v41 = vld [vmem:[%s4215_s11 + $0xd0] sm:$0xf] }
  0x63   : > { %v1050_v25 = vsel %vm4430_vm6, %v1048_v53, %v1049_v56  ;;  %v1054_v55 = vsel %vm4430_vm6, %v3028_v61, %v1053_v58  ;;  %v3029_v30 = vrot.slane %v4607_v12, 10  ;;  %v1063_v10 = vrot.slane %v4615_v20, 6 }
  0x64   : > { %3369 = vmatmul.mubr.msk.bf16.gmra.mrb[28].mxu1 %vm476_vm4, %v4723_v51  ;;  %v1057_v1 = vsel %vm4430_vm6, %v1055_v54, %v1056_v60  ;;  %v4838_v21 = vcombine.low %v1047_v23, %v1050_v25  ;;  %v1062_v9 = vrot.slane %v1060_v3, 4  ;;  %v1804_v58 = vrot.slane %v1802_v28, 4  ;;  %v4866_v60 = vld [vmem:[%s4215_s11 + $0xcc] sm:$0xf] }
  0x65   : > { %3374 = vmatprep.mubr.msk.bf16.mxu1 %vm476_vm4, %v5332_v43  ;;  %v1163_v43 = vsel %vm525_vm0, %v5333_v26, 0  ;;  %v4841_v52 = vcombine.low %v1054_v55, %v1057_v1  ;;  %v3101_v26 = vrot.slane %v4834_v57, 10  ;;  %v1061_v12 = vsel %vm4430_vm6, %v3029_v30, %v1060_v3  ;;  %v252_v3 = vld [vmem:[%s4215_s11 + $0xd4] sm:$0x3] }
  0x66   : > { %3523 = vmatmul.mubr.msk.bf16.gmra.mrb[12].mxu0 %vm476_vm4, %v4763_v33  ;;  %v1064_v20 = vsel %vm4430_vm6, %v1062_v9, %v1063_v10  ;;  %v3081_v53 = vrot.slane %v4834_v57, 9  ;;  %v1579_v56 = vrot.slane %v4812_v2, 5  ;;  %v1809_v23 = vrot.slane %v4847_v41, 6 }
  0x67   : > { %3526 = vmatprep.mubr.msk.bf16.mxu0 %vm476_vm4, %v4765_v14  ;;  %v1803_v61 = vsel %vm4430_vm6, %v3101_v26, %v1802_v28  ;;  %v1586_v25 = vrot.slane %v4847_v41, 5  ;;  %v3082_v30 = vrot.slane %v4866_v60, 9  ;;  %v1589_v28 = vrot.slane %v252_v3, 5 }
  0x68   : > { %v1580_v55 = vsel %vm4217_vm3, %v3081_v53, %v1579_v56  ;;  %v1581_v1 = vrot.slane %v1579_v56, 4  ;;  %v3102_v26 = vrot.slane %v4866_v60, 10 }
  0x69   : > { %v1588_v9 = vrot.slane %v1586_v25, 4  ;;  %v1587_v53 = vsel %vm4217_vm3, %v3082_v30, %v1586_v25  ;;  %v4996_v30 = vld [vmem:[%s4215_s11 + $0xe8] sm:$0xf] }
  0x6a   : > { %v1810_v56 = vsel %vm4430_vm6, %v3102_v26, %v1809_v23 }
  0x6c   : > { %3375 = vmatmul.mubr.msk.bf16.vlgmr.msra.gmra.mrb[0].mxu1 %vm476_vm4, %v5334_v37  ;;  %v1582_v37 = vrot.slane %v249_v5, 5 }
  0x6d   : > { %3407 = vmatpush3.bf16.msra.mxu1 %v1163_v43  ;;  %3378 = vmatprep.mubr.msk.bf16.mxu1 %vm476_vm4, %v4571_v24  ;;  %v1805_v43 = vrot.slane %v249_v5, 6  ;;  %v4873_v5 = vcombine.low %v1061_v12, %v1064_v20  ;;  %v1590_v12 = vsel %vm4217_vm3, %v1588_v9, %v1589_v28  ;;  %v2478_v9 = vrot.slane %v4996_v30, 6 }
  0x6e   : > { %3527 = vmatmul.mubr.msk.bf16.gmra.mrb[16].mxu0 %vm476_vm4, %v4798_v39  ;;  %3905 = vmatprep.subr.msk.bf16.mxu1 %vm525_vm0, %v5299_v62  ;;  %v1811_v62 = vrot.slane %v1809_v23, 4  ;;  %v4889_v20 = vcombine.low %v1587_v53, %v1590_v12  ;;  %v5337_v23 = vrot.slane %v4782_v13, 2  ;;  %v4983_v13 = vld [vmem:[%s4215_s11 + $0xdc] sm:$0xf]  ;;  %v258_v53 = vld [vmem:[%s4215_s11 + $0xec] sm:$0x3] }
  0x6f   : > { %3530 = vmatprep.mubr.msk.bf16.mxu0 %vm476_vm4, %v4801_v7  ;;  %v1806_v54 = vsel %vm4430_vm6, %v1804_v58, %v1805_v43  ;;  %v1812_v58 = vrot.slane %v252_v3, 6  ;;  %v1583_v43 = vsel %vm4217_vm3, %v1581_v1, %v1582_v37  ;;  %v2483_v3 = vld [vmem:[%s5276_s1 + $0x10] sm:$0x3] }
  0x70   : > { %v4876_v10 = vcombine.low %v1803_v61, %v1806_v54  ;;  %v4881_v22 = vcombine.low %v1580_v55, %v1583_v43  ;;  %v5335_v54 = vrot.slane %v4646_v47, 2  ;;  %v5336_v47 = vcombine.low %v4733_v0, %v4757_v34  ;;  %v5339_v0 = vld [vmem:[#allocation19_spill] sm:$0xff]  ;;  %v5340_v34 = vld [vmem:[#allocation8_spill] sm:$0xff] }
  0x71   : > { %v1813_v37 = vsel %vm4430_vm6, %v1811_v62, %v1812_v58  ;;  %v1380_v25 = vsel %vm525_vm0, %v5337_v23, 0  ;;  %v5338_v55 = vcombine.low %v4746_v63, %v4750_v16  ;;  %v4969_v63 = vcombine.low %v4834_v57, %v4812_v2  ;;  %v4980_v16 = vld [vmem:[%s4215_s11 + $0xd8] sm:$0xf] }
  0x72   : > { %v4901_v61 = vcombine.low %v1810_v56, %v1813_v37  ;;  %v2274_v62 = vsel %vm525_vm0, %v5335_v54, 0  ;;  %v4987_v2 = vcombine.low %v4866_v60, %v4847_v41  ;;  %v2471_v57 = vrot.slane %v4983_v13, 6  ;;  %v255_v41 = vld [vmem:[%s4215_s11 + $0xe0] sm:$0x3]  ;;  %v5005_v60 = vld [vmem:[%s4215_s11 + $0xe4] sm:$0xf] }
  0x73   : > { %v3122_v1 = vcombine.low %v4980_v16, %v4983_v13  ;;  %v2474_v58 = vrot.slane %v255_v41, 6  ;;  %v3162_v43 = vrot.slane %v5005_v60, 10  ;;  %v2480_v37 = vrot.slane %v2478_v9, 4 }
  0x74   : > { %3379 = vmatmul.mubr.msk.bf16.gmra.mrb[4].mxu1 %vm476_vm4, %v4595_v18  ;;  %v2473_v26 = vrot.slane %v2471_v57, 4  ;;  %v2481_v54 = vrot.slane %v258_v53, 6  ;;  %v2497_v36 = vsel %vm525_vm0, %v2483_v3, 0 }
  0x75   : > { %3382 = vmatprep.mubr.msk.bf16.mxu1 %vm476_vm4, %v4601_v46 }
  0x76   : > { %3531 = vmatmul.mubr.msk.bf16.gmra.mrb[20].mxu0 %vm476_vm4, %v4838_v21  ;;  %v5016_v12 = vsel %vm4430_vm6, %v2473_v26, %v2474_v58  ;;  %v5028_v23 = vsel %vm4430_vm6, %v2480_v37, %v2481_v54  ;;  %v5349_v26 = vld [vmem:[#allocation9_spill] sm:$0xff]  ;;  %v3140_v58 = vrot.slane %v4980_v16, 9  ;;  %v2254_v54 = vrot.slane %v258_v53, 5 }
  0x77   : > { %3534 = vmatprep.mubr.msk.bf16.mxu0 %vm476_vm4, %v4841_v52 }
  0x7c   : > { %3383 = vmatmul.mubr.msk.bf16.gmra.mrb[8].mxu1 %vm476_vm4, %v4625_v19 }
  0x7d   : > { %3386 = vmatprep.mubr.msk.bf16.mxu1 %vm476_vm4, %v4657_v48 }
  0x7e   : > { %3535 = vmatmul.mubr.msk.bf16.gmra.mrb[24].mxu0 %vm476_vm4, %v4873_v5 }
  0x7f   : > { %3538 = vmatprep.mubr.msk.bf16.mxu0 %vm476_vm4, %v4876_v10 }
  0x84   : > { %3387 = vmatmul.mubr.msk.bf16.gmra.mrb[12].mxu1 %vm476_vm4, %v4665_v45 }
  0x85   : > { %3390 = vmatprep.mubr.msk.bf16.mxu1 %vm476_vm4, %v4679_v15 }
  0x86   : > { %3539 = vmatmul.mubr.msk.bf16.gmra.mrb[28].mxu0 %vm476_vm4, %v4901_v61 }
  0x87   : > { %3544 = vmatprep.mubr.msk.bf16.mxu0 %vm476_vm4, %v4601_v46 }
  0x8c   : > { %3391 = vmatmul.mubr.msk.bf16.gmra.mrb[16].mxu1 %vm476_vm4, %v4684_v44 }
  0x8d   : > { %3394 = vmatprep.mubr.msk.bf16.mxu1 %vm476_vm4, %v4688_v4 }
  0x8e   : > { %3545 = vmatmul.mubr.msk.bf16.vlgmr.msra.gmra.mrb[0].mxu0 %vm476_vm4, %v4625_v19 }
  0x8f   : > { %3577 = vmatpush3.bf16.msra.mxu0 %v2274_v62  ;;  %3548 = vmatprep.mubr.msk.bf16.mxu0 %vm476_vm4, %v4657_v48  ;;  %v3123_v62 = vcombine.low %v5005_v60, %v4996_v30 }
  0x90   : > { %3911 = vmatprep.subr.msk.bf16.mxu0 %vm525_vm0, %v2483_v3  ;;  %v5345_v3 = vld [vmem:[#allocation15_spill] sm:$0xff] }
  0x94   : > { %3395 = vmatmul.mubr.msk.bf16.gmra.mrb[20].mxu1 %vm476_vm4, %v4692_v31 }
  0x95   : > { %3398 = vmatprep.mubr.msk.bf16.mxu1 %vm476_vm4, %v4707_v38 }
  0x96   : > { %3549 = vmatmul.mubr.msk.bf16.gmra.mrb[4].mxu0 %vm476_vm4, %v4665_v45 }
  0x97   : > { %3552 = vmatprep.mubr.msk.bf16.mxu0 %vm476_vm4, %v4679_v15 }
  0x9c   : > { %3399 = vmatmul.mubr.msk.bf16.gmra.mrb[24].mxu1 %vm476_vm4, %v4711_v11 }
  0x9d   : > { %3402 = vmatprep.mubr.msk.bf16.mxu1 %vm476_vm4, %v4715_v29 }
  0x9e   : > { %3553 = vmatmul.mubr.msk.bf16.gmra.mrb[8].mxu0 %vm476_vm4, %v4684_v44 }
  0x9f   : > { %3556 = vmatprep.mubr.msk.bf16.mxu0 %vm476_vm4, %v4688_v4 }
  0xa4   : > { %3403 = vmatmul.mubr.msk.bf16.gmra.mrb[28].mxu1 %vm476_vm4, %v4719_v17 }
  0xa5   : > { %3408 = vmatprep.mubr.msk.bf16.mxu1 %vm476_vm4, %v5336_v47  ;;  %v5024_v47 = vsel %vm4430_vm6, %v3162_v43, %v2478_v9  ;;  %v5348_v9 = vld [vmem:[#allocation23_spill] sm:$0xff] }
  0xa6   : > { %3557 = vmatmul.mubr.msk.bf16.gmra.mrb[12].mxu0 %vm476_vm4, %v4692_v31 }
  0xa7   : > { %3560 = vmatprep.mubr.msk.bf16.mxu0 %vm476_vm4, %v4707_v38 }
  0xac   : > { %3409 = vmatmul.mubr.msk.bf16.vlgmr.msra.gmra.mrb[0].mxu1 %vm476_vm4, %v5338_v55  ;;  %v5341_v55 = vld [vmem:[#allocation11_spill] sm:$0xff] }
  0xad   : > { %3441 = vmatpush3.bf16.msra.mxu1 %v1380_v25  ;;  %3412 = vmatprep.mubr.msk.bf16.mxu1 %vm476_vm4, %v5339_v0  ;;  %v3164_v25 = vcombine.low %v5024_v47, %v5028_v23  ;;  %v5342_v0 = vld [vmem:[#allocation12_spill] sm:$0xff] }
  0xae   : > { %3561 = vmatmul.mubr.msk.bf16.gmra.mrb[16].mxu0 %vm476_vm4, %v4711_v11  ;;  %3907 = vmatprep.subr.msk.bf16.mxu1 %vm525_vm0, %v5340_v34  ;;  %v5343_v34 = vld [vmem:[#allocation13_spill] sm:$0xff] }
  0xaf   : > { %3564 = vmatprep.mubr.msk.bf16.mxu0 %vm476_vm4, %v4715_v29 }
  0xb4   : > { %3413 = vmatmul.mubr.msk.bf16.gmra.mrb[4].mxu1 %vm476_vm4, %v4521_v32  ;;  %v3161_v32 = vrot.slane %v4980_v16, 10 }
  0xb5   : > { %3416 = vmatprep.mubr.msk.bf16.mxu1 %vm476_vm4, %v4528_v49 }
  0xb6   : > { %3565 = vmatmul.mubr.msk.bf16.gmra.mrb[20].mxu0 %vm476_vm4, %v4719_v17  ;;  %v5009_v28 = vsel %vm4430_vm6, %v3161_v32, %v2471_v57  ;;  %v5344_v32 = vld [vmem:[#allocation14_spill] sm:$0xff]  ;;  %v5346_v57 = vld [vmem:[#allocation17_spill] sm:$0xff] }
  0xb7   : > { %3568 = vmatprep.mubr.msk.bf16.mxu0 %vm476_vm4, %v4969_v63  ;;  %v3163_v56 = vcombine.low %v5009_v28, %v5016_v12 }
  0xbc   : > { %3417 = vmatmul.mubr.msk.bf16.gmra.mrb[8].mxu1 %vm476_vm4, %v4575_v50 }
  0xbd   : > { %3420 = vmatprep.mubr.msk.bf16.mxu1 %vm476_vm4, %v4610_v35 }
  0xbe   : > { %3569 = vmatmul.mubr.msk.bf16.gmra.mrb[24].mxu0 %vm476_vm4, %v4987_v2 }
  0xbf   : > { %3572 = vmatprep.mubr.msk.bf16.mxu0 %vm476_vm4, %v3122_v1  ;;  %v5347_v1 = vld [vmem:[#allocation22_spill] sm:$0xff] }
  0xc4   : > { %3421 = vmatmul.mubr.msk.bf16.gmra.mrb[12].mxu1 %vm476_vm4, %v4659_v59 }
  0xc5   : > { %3424 = vmatprep.mubr.msk.bf16.mxu1 %vm476_vm4, %v4673_v6 }
  0xc6   : > { %3573 = vmatmul.mubr.msk.bf16.gmra.mrb[28].mxu0 %vm476_vm4, %v3123_v62 }
  0xc7   : > { %3578 = vmatprep.mubr.msk.bf16.mxu0 %vm476_vm4, %v5341_v55 }
  0xcc   : > { %3425 = vmatmul.mubr.msk.bf16.gmra.mrb[16].mxu1 %vm476_vm4, %v4763_v33 }
  0xcd   : > { %3428 = vmatprep.mubr.msk.bf16.mxu1 %vm476_vm4, %v4765_v14 }
  0xce   : > { %3579 = vmatmul.mubr.msk.bf16.vlgmr.msra.gmra.mrb[0].mxu0 %vm476_vm4, %v5342_v0 }
  0xcf   : > { %3611 = vmatpush3.bf16.msra.mxu0 %v2497_v36  ;;  %3582 = vmatprep.mubr.msk.bf16.mxu0 %vm476_vm4, %v5343_v34 }
  0xd4   : > { %3429 = vmatmul.mubr.msk.bf16.gmra.mrb[20].mxu1 %vm476_vm4, %v4798_v39 }
  0xd5   : > { %3432 = vmatprep.mubr.msk.bf16.mxu1 %vm476_vm4, %v4801_v7 }
  0xd6   : > { %3583 = vmatmul.mubr.msk.bf16.gmra.mrb[4].mxu0 %vm476_vm4, %v5344_v32 }
  0xd7   : > { %3586 = vmatprep.mubr.msk.bf16.mxu0 %vm476_vm4, %v5345_v3 }
  0xdc   : > { %3433 = vmatmul.mubr.msk.bf16.gmra.mrb[24].mxu1 %vm476_vm4, %v4838_v21 }
  0xdd   : > { %3436 = vmatprep.mubr.msk.bf16.mxu1 %vm476_vm4, %v4841_v52 }
  0xde   : > { %3587 = vmatmul.mubr.msk.bf16.gmra.mrb[8].mxu0 %vm476_vm4, %v5346_v57 }
  0xdf   : > { %3590 = vmatprep.mubr.msk.bf16.mxu0 %vm476_vm4, %v5347_v1 }
  0xe4   : > { %3437 = vmatmul.mubr.msk.bf16.gmra.mrb[28].mxu1 %vm476_vm4, %v4873_v5 }
  0xe5   : > { %3442 = vmatprep.mubr.msk.bf16.mxu1 %vm476_vm4, %v4571_v24  ;;  %v2244_v24 = vrot.slane %v4983_v13, 5 }
  0xe6   : > { %3591 = vmatmul.mubr.msk.bf16.gmra.mrb[12].mxu0 %vm476_vm4, %v4557_v42 }
  0xe7   : > { %3594 = vmatprep.mubr.msk.bf16.mxu0 %vm476_vm4, %v5348_v9  ;;  %v2246_v43 = vrot.slane %v2244_v24, 4  ;;  %v2245_v13 = vsel %vm4217_vm3, %v3140_v58, %v2244_v24 }
  0xec   : > { %3443 = vmatmul.mubr.msk.bf16.vlgmr.msra.gmra.mrb[0].mxu1 %vm476_vm4, %v4595_v18  ;;  %v2247_v18 = vrot.slane %v255_v41, 5 }
  0xed   : > { %3645 = vmatpush3.bf16.msra.mxu1 %v5349_v26  ;;  %3446 = vmatprep.mubr.msk.bf16.mxu1 %vm476_vm4, %v4601_v46  ;;  %v2251_v46 = vrot.slane %v4996_v30, 5 }
  0xee   : > { %3595 = vmatmul.mubr.msk.bf16.gmra.mrb[16].mxu0 %vm476_vm4, %v4629_v40  ;;  %v2248_v16 = vsel %vm4217_vm3, %v2246_v43, %v2247_v18 }
  0xef   : > { %3598 = vmatprep.mubr.msk.bf16.mxu0 %vm476_vm4, %v4667_v27  ;;  %v3142_v41 = vcombine.low %v2245_v13, %v2248_v16  ;;  %v2253_v37 = vrot.slane %v2251_v46, 4 }
  0xf1   : > { %v2255_v30 = vsel %vm4217_vm3, %v2253_v37, %v2254_v54 }
  0xf4   : > { %3447 = vmatmul.mubr.msk.bf16.gmra.mrb[4].mxu1 %vm476_vm4, %v4625_v19  ;;  %v3141_v19 = vrot.slane %v5005_v60, 9 }
  0xf5   : > { %3450 = vmatprep.mubr.msk.bf16.mxu1 %vm476_vm4, %v4657_v48 }
  0xf6   : > { %3599 = vmatmul.mubr.msk.bf16.gmra.mrb[20].mxu0 %vm476_vm4, %v4723_v51  ;;  %v2252_v48 = vsel %vm4217_vm3, %v3141_v19, %v2251_v46 }
  0xf7   : > { %3602 = vmatprep.mubr.msk.bf16.mxu0 %vm476_vm4, %v4881_v22  ;;  %v3143_v60 = vcombine.low %v2252_v48, %v2255_v30 }
  0xfc   : > { %3451 = vmatmul.mubr.msk.bf16.gmra.mrb[8].mxu1 %vm476_vm4, %v4665_v45 }
  0xfd   : > { %3454 = vmatprep.mubr.msk.bf16.mxu1 %vm476_vm4, %v4679_v15 }
  0xfe   : > { %3603 = vmatmul.mubr.msk.bf16.gmra.mrb[24].mxu0 %vm476_vm4, %v4889_v20 }
  0xff   : > { %3606 = vmatprep.mubr.msk.bf16.mxu0 %vm476_vm4, %v3142_v41 }
 0x104   : > { %3455 = vmatmul.mubr.msk.bf16.gmra.mrb[12].mxu1 %vm476_vm4, %v4684_v44 }
 0x105   : > { %3458 = vmatprep.mubr.msk.bf16.mxu1 %vm476_vm4, %v4688_v4 }
 0x106   : > { %3607 = vmatmul.mubr.msk.bf16.gmra.mrb[28].mxu0 %vm476_vm4, %v3143_v60 }
 0x107   : > { %3612 = vmatprep.mubr.msk.bf16.mxu0 %vm476_vm4, %v4528_v49 }
 0x10c   : > { %3459 = vmatmul.mubr.msk.bf16.gmra.mrb[16].mxu1 %vm476_vm4, %v4692_v31 }
 0x10d   : > { %3462 = vmatprep.mubr.msk.bf16.mxu1 %vm476_vm4, %v4707_v38 }
 0x10e   : > { %3613 = vmatmul.mubr.msk.bf16.vlgmr.msra.gmra.mrb[0].mxu0 %vm476_vm4, %v4575_v50 }
 0x10f   : > { %3616 = vmatprep.mubr.msk.bf16.mxu0 %vm476_vm4, %v4610_v35 }
 0x114   : > { %3463 = vmatmul.mubr.msk.bf16.gmra.mrb[20].mxu1 %vm476_vm4, %v4711_v11 }
 0x115   : > { %3466 = vmatprep.mubr.msk.bf16.mxu1 %vm476_vm4, %v4715_v29 }
 0x116   : > { %3617 = vmatmul.mubr.msk.bf16.gmra.mrb[4].mxu0 %vm476_vm4, %v4659_v59 }
 0x117   : > { %3620 = vmatprep.mubr.msk.bf16.mxu0 %vm476_vm4, %v4673_v6 }
 0x11c   : > { %3467 = vmatmul.mubr.msk.bf16.gmra.mrb[24].mxu1 %vm476_vm4, %v4719_v17 }
 0x11d   : > { %3470 = vmatprep.mubr.msk.bf16.mxu1 %vm476_vm4, %v4969_v63 }
 0x11e   : > { %3621 = vmatmul.mubr.msk.bf16.gmra.mrb[8].mxu0 %vm476_vm4, %v4763_v33 }
 0x11f   : > { %3624 = vmatprep.mubr.msk.bf16.mxu0 %vm476_vm4, %v4765_v14 }
 0x124   : > { %3471 = vmatmul.mubr.msk.bf16.gmra.mrb[28].mxu1 %vm476_vm4, %v4987_v2 }
 0x125   : > { %3492 = vmatprep.mubr.msk.bf16.mxu1 %vm476_vm4, %v5347_v1 }
 0x126   : > { %3625 = vmatmul.mubr.msk.bf16.gmra.mrb[12].mxu0 %vm476_vm4, %v4798_v39 }
 0x127   : > { %3628 = vmatprep.mubr.msk.bf16.mxu0 %vm476_vm4, %v4801_v7 }
 0x12c   : > { %3493 = vmatmul.mubr.msk.bf16.vlgmr.msra.gmra.mrb[16].mxu1 %vm476_vm4, %v4557_v42 }
 0x12d   : > { %3496 = vmatprep.mubr.msk.bf16.mxu1 %vm476_vm4, %v5348_v9 }
 0x12e   : > { %3629 = vmatmul.mubr.msk.bf16.gmra.mrb[16].mxu0 %vm476_vm4, %v4838_v21 }
 0x12f   : > { %3632 = vmatprep.mubr.msk.bf16.mxu0 %vm476_vm4, %v4841_v52 }
 0x134   : > { %3497 = vmatmul.mubr.msk.bf16.gmra.mrb[20].mxu1 %vm476_vm4, %v4629_v40 }
 0x135   : > { %3500 = vmatprep.mubr.msk.bf16.mxu1 %vm476_vm4, %v4667_v27 }
 0x136   : > { %3633 = vmatmul.mubr.msk.bf16.gmra.mrb[20].mxu0 %vm476_vm4, %v4873_v5 }
 0x137   : > { %3636 = vmatprep.mubr.msk.bf16.mxu0 %vm476_vm4, %v4876_v10 }
 0x13c   : > { %3501 = vmatmul.mubr.msk.bf16.gmra.mrb[24].mxu1 %vm476_vm4, %v4723_v51 }
 0x13d   : > { %3504 = vmatprep.mubr.msk.bf16.mxu1 %vm476_vm4, %v4881_v22 }
 0x13e   : > { %3637 = vmatmul.mubr.msk.bf16.gmra.mrb[24].mxu0 %vm476_vm4, %v4901_v61 }
 0x13f   : > { %3640 = vmatprep.mubr.msk.bf16.mxu0 %vm476_vm4, %v3163_v56 }
 0x144   : > { %3505 = vmatmul.mubr.msk.bf16.gmra.mrb[28].mxu1 %vm476_vm4, %v4889_v20 }
 0x146   : > { %3641 = vmatmul.mubr.msk.bf16.gmra.mrb[28].mxu0 %vm476_vm4, %v3164_v25 }
 0x1bf   : > { %v3444_v8 = vpop.f32.mrb[0].mxu1 }
 0x1c0   : > { %v1416_v49 = vpop.f32.mrb[1].mxu1 }
 0x1c1   : > { %v3445_v42 = vpop.f32.mrb[2].mxu1 }
 0x1c2   : > { %v1419_v50 = vpop.f32.mrb[3].mxu1 }
 0x1c7   : > { %v3448_v35 = vpop.f32.mrb[4].mxu1 }
 0x1c8   : > { %v1432_v40 = vpop.f32.mrb[5].mxu1 }
 0x1c9   : > { %v3449_v59 = vpop.f32.mrb[6].mxu1 }
 0x1ca   : > { %v1435_v45 = vpop.f32.mrb[7].mxu1 }
 0x1cf   : > { %v3452_v27 = vpop.f32.mrb[8].mxu1 }
 0x1d0   : > { %v1448_v6 = vpop.f32.mrb[9].mxu1 }
 0x1d1   : > { %v3453_v15 = vpop.f32.mrb[10].mxu1 }
 0x1d2   : > { %v1451_v22 = vpop.f32.mrb[11].mxu1 }
 0x1d7   : > { %v3456_v44 = vpop.f32.mrb[12].mxu1 }
 0x1d8   : > { %v1464_v4 = vpop.f32.mrb[13].mxu1 }
 0x1d9   : > { %v5179_v31 = vpop.f32.mrb[14].mxu1 }
 0x1da   : > { %v5181_v38 = vpop.f32.mrb[15].mxu1 }
 0x1e1   : > { %v3614_v11 = vpop.f32.mrb[0].mxu0 }
 0x1e2   : > { %v3646_v29 = vadd.f32 %v3614_v11, %v3444_v8  ;;  %v2533_v17 = vpop.f32.mrb[1].mxu0 }
 0x1e3   : > { %v3647_v51 = vadd.f32 %v2533_v17, %v1416_v49  ;;  %v3615_v33 = vpop.f32.mrb[2].mxu0 }
 0x1e4   : > { %v3648_v14 = vadd.f32 %v3615_v33, %v3445_v42  ;;  %v2536_v39 = vpop.f32.mrb[3].mxu0  ;;  %v2732_v10 = vmul.f32 %v3646_v29, %v3646_v29 }
 0x1e5   : > { %v3649_v7 = vadd.f32 %v2536_v39, %v1419_v50  ;;  %v2730_v21 = vmul.f32 %v3647_v51, %v3647_v51 }
 0x1e6   : > { %v2733_v53 = vmul.f32 %v3648_v14, %v3648_v14 }
 0x1e7   : > { %v2692_v52 = vadd.f32 %v3649_v7, %v3647_v51  ;;  %v2731_v5 = vmul.f32 %v3649_v7, %v3649_v7 }
 0x1e9   : > { %v2693_v20 = vadd.f32 %v3646_v29, %v2692_v52  ;;  %v2762_v61 = vadd.f32 %v2731_v5, %v2730_v21  ;;  %v3618_v63 = vpop.f32.mrb[4].mxu0 }
 0x1ea   : > { %v3650_v2 = vadd.f32 %v3618_v63, %v3448_v35  ;;  %v2549_v28 = vpop.f32.mrb[5].mxu0 }
 0x1eb   : > { %v2763_v12 = vadd.f32 %v2762_v61, %v2732_v10  ;;  %v3651_v56 = vadd.f32 %v2549_v28, %v1432_v40  ;;  %v2694_v62 = vadd.f32 %v3648_v14, %v2693_v20  ;;  %v3619_v47 = vpop.f32.mrb[6].mxu0 }
 0x1ec   : > { %v3652_v23 = vadd.f32 %v3619_v47, %v3449_v59  ;;  %v2552_v25 = vpop.f32.mrb[7].mxu0  ;;  %v2736_v1 = vmul.f32 %v3650_v2, %v3650_v2 }
 0x1ed   : > { %v2695_v55 = vadd.f32 %v3651_v56, %v2694_v62  ;;  %v2734_v36 = vmul.f32 %v3651_v56, %v3651_v56  ;;  %v2764_v0 = vadd.f32 %v2763_v12, %v2733_v53  ;;  %v3653_v34 = vadd.f32 %v2552_v25, %v1435_v45 }
 0x1ee   : > { %v2737_v18 = vmul.f32 %v3652_v23, %v3652_v23 }
 0x1ef   : > { %v2765_v32 = vadd.f32 %v2764_v0, %v2734_v36  ;;  %v2696_v3 = vadd.f32 %v3653_v34, %v2695_v55  ;;  %v2735_v57 = vmul.f32 %v3653_v34, %v3653_v34 }
 0x1f1   : > { %v2697_v9 = vadd.f32 %v3650_v2, %v2696_v3  ;;  %v2766_v26 = vadd.f32 %v2765_v32, %v2735_v57  ;;  %v3622_v24 = vpop.f32.mrb[8].mxu0 }
 0x1f2   : > { %v3654_v58 = vadd.f32 %v3622_v24, %v3452_v27  ;;  %v2565_v43 = vpop.f32.mrb[9].mxu0 }
 0x1f3   : > { %v2767_v46 = vadd.f32 %v2766_v26, %v2736_v1  ;;  %v3655_v13 = vadd.f32 %v2565_v43, %v1448_v6  ;;  %v2698_v16 = vadd.f32 %v3652_v23, %v2697_v9  ;;  %v3623_v19 = vpop.f32.mrb[10].mxu0 }
 0x1f4   : > { %v3656_v41 = vadd.f32 %v3623_v19, %v3453_v15  ;;  %v2568_v37 = vpop.f32.mrb[11].mxu0  ;;  %v2740_v50 = vmul.f32 %v3654_v58, %v3654_v58 }
 0x1f5   : > { %v2699_v54 = vadd.f32 %v3655_v13, %v2698_v16  ;;  %v2738_v48 = vmul.f32 %v3655_v13, %v3655_v13  ;;  %v2768_v30 = vadd.f32 %v2767_v46, %v2737_v18  ;;  %v3657_v60 = vadd.f32 %v2568_v37, %v1451_v22 }
 0x1f6   : > { %v2741_v11 = vmul.f32 %v3656_v41, %v3656_v41 }
 0x1f7   : > { %v2769_v8 = vadd.f32 %v2768_v30, %v2738_v48  ;;  %v2700_v49 = vadd.f32 %v3657_v60, %v2699_v54  ;;  %v2739_v42 = vmul.f32 %v3657_v60, %v3657_v60 }
 0x1f9   : > { %v2701_v35 = vadd.f32 %v3654_v58, %v2700_v49  ;;  %v2770_v40 = vadd.f32 %v2769_v8, %v2739_v42  ;;  %v3626_v59 = vpop.f32.mrb[12].mxu0 }
 0x1fa   : > { %v3658_v45 = vadd.f32 %v3626_v59, %v3456_v44  ;;  %v2581_v27 = vpop.f32.mrb[13].mxu0 }
 0x1fb   : > { %v2771_v29 = vadd.f32 %v2770_v40, %v2740_v50  ;;  %v3659_v6 = vadd.f32 %v2581_v27, %v1464_v4  ;;  %v2702_v17 = vadd.f32 %v3656_v41, %v2701_v35  ;;  %v3627_v51 = vpop.f32.mrb[14].mxu0 }
 0x1fc   : > { %v3660_v15 = vadd.f32 %v3627_v51, %v5179_v31  ;;  %v2584_v33 = vpop.f32.mrb[15].mxu0  ;;  %v2744_v44 = vmul.f32 %v3658_v45, %v3658_v45 }
 0x1fd   : > { %v2703_v14 = vadd.f32 %v3659_v6, %v2702_v17  ;;  %v2742_v39 = vmul.f32 %v3659_v6, %v3659_v6  ;;  %v2772_v22 = vadd.f32 %v2771_v29, %v2741_v11  ;;  %v3661_v7 = vadd.f32 %v2584_v33, %v5181_v38 }
 0x1fe   : > { %v2745_v31 = vmul.f32 %v3660_v15, %v3660_v15 }
 0x1ff   : > { %v2773_v21 = vadd.f32 %v2772_v22, %v2742_v39  ;;  %v2704_v52 = vadd.f32 %v3661_v7, %v2703_v14  ;;  %v2743_v5 = vmul.f32 %v3661_v7, %v3661_v7  ;;  %v3494_v10 = vpop.f32.mrb[16].mxu1 }
 0x200   : > { %v1705_v20 = vpop.f32.mrb[17].mxu1 }
 0x201   : > { %v2705_v61 = vadd.f32 %v3658_v45, %v2704_v52  ;;  %v2774_v63 = vadd.f32 %v2773_v21, %v2743_v5  ;;  %v3630_v2 = vpop.f32.mrb[16].mxu0  ;;  %v3495_v4 = vpop.f32.mrb[18].mxu1 }
 0x202   : > { %v3662_v28 = vadd.f32 %v3630_v2, %v3494_v10  ;;  %v2597_v53 = vpop.f32.mrb[17].mxu0  ;;  %v1708_v12 = vpop.f32.mrb[19].mxu1 }
 0x203   : > { %v2775_v56 = vadd.f32 %v2774_v63, %v2744_v44  ;;  %v3663_v62 = vadd.f32 %v2597_v53, %v1705_v20  ;;  %v2706_v47 = vadd.f32 %v3660_v15, %v2705_v61  ;;  %v3631_v23 = vpop.f32.mrb[18].mxu0 }
 0x204   : > { %v3664_v25 = vadd.f32 %v3631_v23, %v3495_v4  ;;  %v2600_v38 = vpop.f32.mrb[19].mxu0  ;;  %v2748_v26 = vmul.f32 %v3662_v28, %v3662_v28 }
 0x205   : > { %v2707_v55 = vadd.f32 %v3663_v62, %v2706_v47  ;;  %v2746_v36 = vmul.f32 %v3663_v62, %v3663_v62  ;;  %v2776_v0 = vadd.f32 %v2775_v56, %v2745_v31  ;;  %v3665_v34 = vadd.f32 %v2600_v38, %v1708_v12 }
 0x206   : > { %v2749_v19 = vmul.f32 %v3664_v25, %v3664_v25 }
 0x207   : > { %v2777_v32 = vadd.f32 %v2776_v0, %v2746_v36  ;;  %v2708_v3 = vadd.f32 %v3665_v34, %v2707_v55  ;;  %v2747_v57 = vmul.f32 %v3665_v34, %v3665_v34  ;;  %v3498_v1 = vpop.f32.mrb[20].mxu1 }
 0x208   : > { %v1721_v9 = vpop.f32.mrb[21].mxu1 }
 0x209   : > { %v2709_v24 = vadd.f32 %v3662_v28, %v2708_v3  ;;  %v2778_v58 = vadd.f32 %v2777_v32, %v2747_v57  ;;  %v3634_v43 = vpop.f32.mrb[20].mxu0  ;;  %v3499_v18 = vpop.f32.mrb[22].mxu1 }
 0x20a   : > { %v3666_v46 = vadd.f32 %v3634_v43, %v3498_v1  ;;  %v2613_v13 = vpop.f32.mrb[21].mxu0  ;;  %v1724_v16 = vpop.f32.mrb[23].mxu1 }
 0x20b   : > { %v2779_v41 = vadd.f32 %v2778_v58, %v2748_v26  ;;  %v3667_v37 = vadd.f32 %v2613_v13, %v1721_v9  ;;  %v2710_v54 = vadd.f32 %v3664_v25, %v2709_v24  ;;  %v3635_v48 = vpop.f32.mrb[22].mxu0 }
 0x20c   : > { %v3668_v30 = vadd.f32 %v3635_v48, %v3499_v18  ;;  %v2616_v60 = vpop.f32.mrb[23].mxu0  ;;  %v2752_v11 = vmul.f32 %v3666_v46, %v3666_v46 }
 0x20d   : > { %v2711_v8 = vadd.f32 %v3667_v37, %v2710_v54  ;;  %v2750_v49 = vmul.f32 %v3667_v37, %v3667_v37  ;;  %v2780_v42 = vadd.f32 %v2779_v41, %v2749_v19  ;;  %v3669_v50 = vadd.f32 %v2616_v60, %v1724_v16 }
 0x20e   : > { %v2753_v39 = vmul.f32 %v3668_v30, %v3668_v30 }
 0x20f   : > { %v2781_v35 = vadd.f32 %v2780_v42, %v2750_v49  ;;  %v2712_v40 = vadd.f32 %v3669_v50, %v2711_v8  ;;  %v2751_v59 = vmul.f32 %v3669_v50, %v3669_v50  ;;  %v3502_v45 = vpop.f32.mrb[24].mxu1 }
 0x210   : > { %v1737_v27 = vpop.f32.mrb[25].mxu1 }
 0x211   : > { %v2713_v29 = vadd.f32 %v3666_v46, %v2712_v40  ;;  %v2782_v6 = vadd.f32 %v2781_v35, %v2751_v59  ;;  %v3638_v17 = vpop.f32.mrb[24].mxu0  ;;  %v3503_v51 = vpop.f32.mrb[26].mxu1 }
 0x212   : > { %v3670_v15 = vadd.f32 %v3638_v17, %v3502_v45  ;;  %v2629_v33 = vpop.f32.mrb[25].mxu0  ;;  %v1740_v14 = vpop.f32.mrb[27].mxu1 }
 0x213   : > { %v2783_v22 = vadd.f32 %v2782_v6, %v2752_v11  ;;  %v3671_v7 = vadd.f32 %v2629_v33, %v1737_v27  ;;  %v2714_v21 = vadd.f32 %v3668_v30, %v2713_v29  ;;  %v3639_v52 = vpop.f32.mrb[26].mxu0 }
 0x214   : > { %v3672_v5 = vadd.f32 %v3639_v52, %v3503_v51  ;;  %v2632_v10 = vpop.f32.mrb[27].mxu0  ;;  %v2756_v31 = vmul.f32 %v3670_v15, %v3670_v15 }
 0x215   : > { %v2715_v20 = vadd.f32 %v3671_v7, %v2714_v21  ;;  %v2754_v44 = vmul.f32 %v3671_v7, %v3671_v7  ;;  %v2784_v61 = vadd.f32 %v2783_v22, %v2753_v39  ;;  %v3673_v63 = vadd.f32 %v2632_v10, %v1740_v14 }
 0x216   : > { %v2757_v36 = vmul.f32 %v3672_v5, %v3672_v5 }
 0x217   : > { %v2785_v2 = vadd.f32 %v2784_v61, %v2754_v44  ;;  %v2716_v4 = vadd.f32 %v3673_v63, %v2715_v20  ;;  %v2755_v28 = vmul.f32 %v3673_v63, %v3673_v63  ;;  %v3506_v53 = vpop.f32.mrb[28].mxu1 }
 0x218   : > { %v1753_v12 = vpop.f32.mrb[29].mxu1 }
 0x219   : > { %v2717_v56 = vadd.f32 %v3670_v15, %v2716_v4  ;;  %v2786_v62 = vadd.f32 %v2785_v2, %v2755_v28  ;;  %v3642_v47 = vpop.f32.mrb[28].mxu0  ;;  %v3507_v23 = vpop.f32.mrb[30].mxu1 }
 0x21a   : > { %v3674_v25 = vadd.f32 %v3642_v47, %v3506_v53  ;;  %v2645_v38 = vpop.f32.mrb[29].mxu0  ;;  %v1756_v55 = vpop.f32.mrb[31].mxu1 }
 0x21b   : > { %v2787_v0 = vadd.f32 %v2786_v62, %v2756_v31  ;;  %v3675_v34 = vadd.f32 %v2645_v38, %v1753_v12  ;;  %v2718_v32 = vadd.f32 %v3672_v5, %v2717_v56  ;;  %v3643_v3 = vpop.f32.mrb[30].mxu0 }
 0x21c   : > { %v3676_v57 = vadd.f32 %v3643_v3, %v3507_v23  ;;  %v2648_v1 = vpop.f32.mrb[31].mxu0  ;;  %v2760_v13 = vmul.f32 %v3674_v25, %v3674_v25 }
 0x21d   : > { %v2719_v9 = vadd.f32 %v3675_v34, %v2718_v32  ;;  %v2758_v26 = vmul.f32 %v3675_v34, %v3675_v34  ;;  %v2788_v24 = vadd.f32 %v2787_v0, %v2757_v36  ;;  %v3677_v58 = vadd.f32 %v2648_v1, %v1756_v55 }
 0x21e   : > { %v2761_v41 = vmul.f32 %v3676_v57, %v3676_v57 }
 0x21f   : > { %v2789_v43 = vadd.f32 %v2788_v24, %v2758_v26  ;;  %v2720_v18 = vadd.f32 %v3677_v58, %v2719_v9  ;;  %v2759_v46 = vmul.f32 %v3677_v58, %v3677_v58 }
 0x221   : > { %v2721_v16 = vadd.f32 %v3674_v25, %v2720_v18  ;;  %v2790_v19 = vadd.f32 %v2789_v43, %v2759_v46 }
 0x223   : > { %v2722_v37 = vadd.f32 %v3676_v57, %v2721_v16  ;;  %v2791_v54 = vadd.f32 %v2790_v19, %v2760_v13 }
 0x225   : > { %v2723_v48 = vrot.slane %v2722_v37, 4  ;;  %v2792_v30 = vadd.f32 %v2791_v54, %v2761_v41 }
 0x227   : > { %v2724_v60 = vadd.f32 %v2723_v48, %v2722_v37  ;;  %v2793_v8 = vrot.slane %v2792_v30, 4 }
 0x229   : > { %v2725_v49 = vrot.slane %v2724_v60, 2  ;;  %v2794_v42 = vadd.f32 %v2793_v8, %v2792_v30 }
 0x22b   : > { %v2726_v50 = vadd.f32 %v2725_v49, %v2724_v60  ;;  %v2795_v35 = vrot.slane %v2794_v42, 2 }
 0x22d   : > { %v2727_v40 = vrot.slane %v2726_v50, 1  ;;  %v2796_v59 = vadd.f32 %v2795_v35, %v2794_v42 }
 0x22f   : > { %v2728_v45 = vadd.f32 %v2727_v40, %v2726_v50  ;;  %v2797_v27 = vrot.slane %v2796_v59, 1 }
 0x231   : > { %2729 = vst [vmem:[%s182_s7] sm:$0x1] %v2728_v45  ;;  %v2798_v11 = vadd.f32 %v2797_v27, %v2796_v59 }
 0x232   : > { %4010 = shalt.err (!%p4007_p5)
}
 0x233   : > { %s4011_s4 = scalar_lea.hbm %s5196_s19, 16  ;;  %s4015_s11 = scalar_lea.hbm %s5277_s2, 32 }
 0x234   : > { %p4012_p6 = scmp.ne.s32.totalorder %s5196_s19, %s4011_s4  ;;  %p4016_p10 = scmp.lt.u32.totalorder %s5196_s19, %s5277_s2 }
 0x235   : > { %p4017_p11 = scmp.lt.u32.totalorder %s4015_s11, %s4011_s4  ;;  %p4019_p13 = scmp.lt.u32.totalorder %s4011_s4, %s5196_s19 }
 0x236   : > { %p4013_p7 = pnand %p4012_p6, %p4171_p4 }
 0x237   : > { %p4018_p12 = por %p4017_p11, %p4016_p10 }
 0x238   : > { %p4014_p9 = pneg %p4013_p7 }
 0x239   : > { %p4020_p0 = por %p4019_p13, %p4018_p12 }
 0x23b   : > { %p4021_p1 = pnand %p4020_p0, %p4014_p9 }
 0x23d   : > { %4024 = shalt.err (!%p4021_p1)
}
 0x23e   : > { %3913 = dma.vmem_to_hbm [thread:$0]  (%p4171_p4), %s5198_s8, 16, %s5196_s19, %s2801_s26   ;;  %2799 = vst [vmem:[%s188_s9] sm:$0x1] %v2798_v11 }
 0x23f   : > { %s2805_s21 = scalar_lea.sflag [#allocation5], %s5186_s5  ;;  %s4025_s27 = scalar_lea.vmem %s5205_s10, 16 }
 0x240   : > { %p4026_p2 = scmp.ne.s32.totalorder %s5205_s10, %s4025_s27  ;;  %s4110_s28 = smov [#allocation4]  }
 0x241   : > { %s4029_s29 = sshll.u32 %s4110_s28, 4  ;;  %s4030_s29 = int_to_ptr.vmem [resolvable:$false] %s4029_s29 }
 0x242   : > { %p4027_p3 = pnand %p4026_p2, %p4171_p4  ;;  %s4031_s30 = scalar_lea.vmem %s4030_s29, 32 }
 0x243   : > { %p4032_p6 = scmp.lt.s32.totalorder %s5205_s10, %s4030_s29  ;;  %p4033_p7 = scmp.lt.s32.totalorder %s4031_s30, %s4025_s27 }
 0x244   : > { %p4028_p5 = pneg %p4027_p3 }
 0x245   : > { %p4034_p9 = por %p4033_p7, %p4032_p6 }
 0x247   : > { %p4035_p10 = pnand %p4034_p9, %p4028_p5 }
 0x249   : > { %4038 = shalt.err (!%p4035_p10)
}
 0x24a   : > { %s4039_s5 = scalar_lea.hbm %s5203_s23, 16  ;;  %s4043_s19 = scalar_lea.hbm %s5278_s3, 32 }
 0x24b   : > { %p4040_p11 = scmp.ne.s32.totalorder %s5203_s23, %s4039_s5  ;;  %p4044_p0 = scmp.lt.u32.totalorder %s5203_s23, %s5278_s3 }
 0x24c   : > { %p4045_p1 = scmp.lt.u32.totalorder %s4043_s19, %s4039_s5  ;;  %p4047_p3 = scmp.lt.u32.totalorder %s4039_s5, %s5203_s23 }
 0x24d   : > { %p4041_p12 = pnand %p4040_p11, %p4171_p4 }
 0x24e   : > { %p4046_p2 = por %p4045_p1, %p4044_p0 }
 0x24f   : > { %p4042_p13 = pneg %p4041_p12 }
 0x250   : > { %p4048_p5 = por %p4047_p3, %p4046_p2 }
 0x252   : > { %p4049_p6 = pnand %p4048_p5, %p4042_p13 }
 0x254   : > { %4052 = shalt.err (!%p4049_p6)
}
 0x255   : > { %3914 = dma.vmem_to_hbm [thread:$0]  (%p4171_p4), %s5205_s10, 16, %s5203_s23, %s2805_s21  }
 0x256 PF: > { %p3924_p7 = scmp.ge.s32.totalorder %s4107_s17, 2  ;;  %s2844_s6 = sand.u32 1, %s4087_s12  }
 0x257   : > { %s2845_s7 = scalar_lea.sflag [#allocation3], %s2844_s6 }
 0x258   : > { %p3918_p9 = pnand %p3924_p7, %p4178_p8 }
 0x25a   : > { %4078 = dma.done.wait (!%p3918_p9), %s2845_s7, 16  }
 0x25b   : > { %4080 = vsyncadd (!%p3918_p9), %s2845_s7, 4294967280  ;;  %s2853_s11 = scalar_lea.sflag [#allocation5], %s2844_s6 }
 0x25c   : > { %4082 = dma.done.wait (!%p3918_p9), %s2853_s11, 16  }
 0x25d   : > { %4084 = vsyncadd (!%p3918_p9), %s2853_s11, 4294967280  ;;  %s20_s17 = sadd.s32 1, %s4107_s17   ;;  %s5350_s12 = smov %s4091_s13 }
 0x25e   : > { %p17_p10 = scmp.ge.s32.totalorder %s20_s17, 4   ;;  %s5351_s13 = smov %s4095_s14 }
 0x25f   : > { %s5352_s14 = smov %s4184_s25  ;;  %s5353_s15 = smov %s4103_s16 }
 0x260   : > { %s5354_s16 = smov %s5356_s20  ;;  %19 = sbr.rel (!%p17_p10) target bundleno = 6 (0x6), region = 81 }
 0x267   :  { %2857 = vsyncpa [#allocation3], 1 }
 0x268   :  { %2859 = vsyncpa [#allocation3 + $0x1], 1 }
 0x269   :  { %2860 = vsyncpa [#allocation5], 1 }
 0x26a   :  { %2862 = vsyncpa [#allocation5 + $0x1], 1 }

</bundles_post_ra>
